<compile_context>
chip_gen: v6e
topology: v6e:2x2x1
jax: 0.10.0
libtpu: 0.0.40
codegen_flags: <defaults>
</compile_context>

<pallas_src>
import functools

import jax
import jax.numpy as jnp
from jax import lax
from jax.experimental import pallas as pl
from jax.experimental.pallas import tpu as pltpu


def convblock_kernel(x_ref, mask_ref, w1_ref, b1_ref, w2_ref, b2_ref,
                     a1_ref, a2_ref, o_ref, *, H, W, Cb, Cob):
    # x_ref   : (1, Cb, HW)      VMEM  nb packed images; pixels lane-dense
    # mask_ref: (9, HW)          VMEM  per-tap 0/1 boundary masks (constant)
    # w1_ref  : (Cb, Cb)         VMEM  1x1 weights, BN1 scale folded
    #                                  (block-diagonal across packed images)
    # b1_ref  : (Cb, 1)          VMEM  BN1 shift
    # w2_ref  : (9, Cob, Cb)     VMEM  3x3 weights, BN2 scale folded
    # b2_ref  : (Cob, 1)         VMEM  BN2 shift
    # a1_ref, a2_ref: (1,)       SMEM  PReLU alphas (scalars)
    # o_ref   : (1, Cob, HW)
    HW = H * W
    x = x_ref[0]                                       # (Cb, HW) f32

    # ---- conv1 (1x1) + bn1 + PReLU: one vector MAC per input channel -------
    acc = w1_ref[:, 0:1] * x[0:1, :]                   # (Cb,1)*(1,HW)->(Cb,HW)
    for ci in range(1, Cb):
        acc = acc + w1_ref[:, ci:ci + 1] * x[ci:ci + 1, :]
    h = acc + b1_ref[...]
    a1 = a1_ref[0]
    h = jnp.where(h > 0, h, a1 * h)

    # ---- dropout: identity (eval mode) --------------------------------------

    # ---- conv2 (3x3, stride 1, pad 1) via lane rolls + precomputed masks ----
    acc2 = None
    for dh in (-1, 0, 1):
        for dw in (-1, 0, 1):
            t = (dh + 1) * 3 + (dw + 1)
            shift = dh * W + dw
            if shift == 0:
                tap = h                                 # center tap: no mask
            else:
                # tap[p] = h[p + shift]; wrap-around zeroed by the mask row.
                tap = pltpu.roll(h, shift=(-shift) % HW, axis=1)
                tap = tap * mask_ref[t:t + 1, :]
            contrib = w2_ref[t, :, 0:1] * tap[0:1, :]   # (Cob,1)*(1,HW)
            for ci in range(1, Cb):
                contrib = contrib + w2_ref[t, :, ci:ci + 1] * tap[ci:ci + 1, :]
            acc2 = contrib if acc2 is None else acc2 + contrib

    # ---- bn2 shift + PReLU + residual ---------------------------------------
    y = acc2 + b2_ref[...]
    a2 = a2_ref[0]
    y = jnp.where(y > 0, y, a2 * y)
    o_ref[0] = (y + x).astype(o_ref.dtype)              # residual (Cout == C)


def _tap_masks(H, W):
    """(9, H*W) f32: 1.0 where tap (dh, dw) reads an in-bounds neighbor."""
    pos = jnp.arange(H * W, dtype=jnp.int32)
    row, col = pos // W, pos % W
    rows = []
    for dh in (-1, 0, 1):
        for dw in (-1, 0, 1):
            m = jnp.ones((H * W,), jnp.bool_)
            if dh == -1:
                m = m & (row >= 1)
            elif dh == 1:
                m = m & (row <= H - 2)
            if dw == -1:
                m = m & (col >= 1)
            elif dw == 1:
                m = m & (col <= W - 2)
            rows.append(m)
    return jnp.stack(rows).astype(jnp.float32)


def _block_diag(nb, w):
    """Replicate per-image weights into a block-diagonal multi-image matrix."""
    if nb == 1:
        return w
    eye = jnp.eye(nb, dtype=w.dtype)
    if w.ndim == 2:                                      # (Co, Ci)
        o, i = w.shape
        return jnp.einsum('bd,oi->bodi', eye, w).reshape(nb * o, nb * i)
    t, o, i = w.shape                                    # (9, Co, Ci)
    return jnp.einsum('bd,toi->tbodi', eye, w).reshape(t, nb * o, nb * i)


def conv_block_forward(x_nchw, w1f, b1, a1, w2f, b2, a2):
    """x_nchw: (N, C, H, W) f32 -> (N, Cout, H, W) f32.

    w1f: (C, C) 1x1 weights with BN1 scale folded; w2f: (9, Cout, C) 3x3
    weights (tap-major, kh*3+kw) with BN2 scale folded; b1/b2: BN shifts;
    a1/a2: (1,) PReLU alphas.
    """
    N, C, H, W = x_nchw.shape
    Cout = w2f.shape[1]
    assert Cout == C, "residual add requires inplanes == outplanes"
    HW = H * W
    assert HW % 128 == 0, "flattened spatial axis must be a multiple of 128"

    # Pack `nb` images per grid step so nb*C fills the 8 sublanes of a vreg,
    # but only when >= 2 grid steps remain (keeps both v7x TensorCores busy).
    nb = 1
    cand = max(1, 8 // C)
    while cand > 1:
        if C * cand <= 8 and N % cand == 0 and N // cand >= 2:
            nb = cand
            break
        cand //= 2
    Cb, Cob = nb * C, nb * Cout

    # Rough VMEM guard: double-buffered in/out blocks + constant mask slab.
    block_bytes = 4 * (2 * Cb * HW + 2 * Cob * HW + 9 * HW)
    assert block_bytes < 16 * 1024 * 1024, "H*W too large; add spatial tiling"

    x = x_nchw.reshape(N // nb, Cb, HW)                  # contiguous: free
    masks = _tap_masks(H, W)                             # (9, HW), DMA'd once
    w1b = _block_diag(nb, w1f)                           # (Cb, Cb)
    w2b = _block_diag(nb, w2f)                           # (9, Cob, Cb)
    b1b = jnp.tile(b1, nb).reshape(Cb, 1)
    b2b = jnp.tile(b2, nb).reshape(Cob, 1)

    kernel = functools.partial(convblock_kernel, H=H, W=W, Cb=Cb, Cob=Cob)
    smem = pl.BlockSpec(memory_space=pltpu.MemorySpace.SMEM)
    const2 = lambda n: (0, 0)
    const3 = lambda n: (0, 0, 0)

    out = pl.pallas_call(
        kernel,
        out_shape=jax.ShapeDtypeStruct((N // nb, Cob, HW), jnp.float32),
        grid=(N // nb,),
        in_specs=[
            pl.BlockSpec((1, Cb, HW), lambda n: (n, 0, 0)),  # lane-dense slab
            pl.BlockSpec((9, HW), const2),                   # tap masks (const)
            pl.BlockSpec((Cb, Cb), const2),                  # w1 (const)
            pl.BlockSpec((Cb, 1), const2),                   # bn1 shift (const)
            pl.BlockSpec((9, Cob, Cb), const3),              # w2 (const)
            pl.BlockSpec((Cob, 1), const2),                  # bn2 shift (const)
            smem, smem,                                      # PReLU alphas
        ],
        out_specs=pl.BlockSpec((1, Cob, HW), lambda n: (n, 0, 0)),
        compiler_params=pltpu.CompilerParams(
            dimension_semantics=("parallel",)),              # batch across TCs
    )(x, masks, w1b, b1b, w2b, b2b, a1, a2)

    return out.reshape(N, Cout, H, W)                    # contiguous: free


def ref_forward(x_nchw, w1, w2, s1, b1, a1, s2, b2, a2):
    """Pure-JAX reference with the same eval-mode semantics."""
    dn = ('NCHW', 'OIHW', 'NCHW')
    y = lax.conv_general_dilated(x_nchw, w1, (1, 1), 'VALID',
                                 dimension_numbers=dn)
    y = y * s1[None, :, None, None] + b1[None, :, None, None]
    y = jnp.where(y > 0, y, a1[0] * y)
    y = lax.conv_general_dilated(y, w2, (1, 1), ((1, 1), (1, 1)),
                                 dimension_numbers=dn)
    y = y * s2[None, :, None, None] + b2[None, :, None, None]
    y = jnp.where(y > 0, y, a2[0] * y)
    return y + x_nchw


if __name__ == "__main__":
    eps = 1e-5

    def run_case(key, N, C, H, W):
        Cin, Cout = C, C                 # residual requires inplanes == outplanes
        ks = jax.random.split(key, 11)

        # conv weights (PyTorch OIHW layout), no bias.
        w1 = 0.1 * jax.random.normal(ks[0], (Cin, Cin, 1, 1), jnp.float32)
        w2 = 0.1 * jax.random.normal(ks[1], (Cout, Cin, 3, 3), jnp.float32)

        # BatchNorm params + running stats (eval mode) -> scale/shift.
        gamma1 = 1.0 + 0.1 * jax.random.normal(ks[2], (Cin,), jnp.float32)
        beta1 = 0.1 * jax.random.normal(ks[3], (Cin,), jnp.float32)
        mean1 = 0.1 * jax.random.normal(ks[4], (Cin,), jnp.float32)
        var1 = jax.random.uniform(ks[5], (Cin,), jnp.float32, 0.5, 1.5)
        gamma2 = 1.0 + 0.1 * jax.random.normal(ks[6], (Cout,), jnp.float32)
        beta2 = 0.1 * jax.random.normal(ks[7], (Cout,), jnp.float32)
        mean2 = 0.1 * jax.random.normal(ks[8], (Cout,), jnp.float32)
        var2 = jax.random.uniform(ks[9], (Cout,), jnp.float32, 0.5, 1.5)

        scale1 = gamma1 / jnp.sqrt(var1 + eps)
        shift1 = beta1 - scale1 * mean1
        scale2 = gamma2 / jnp.sqrt(var2 + eps)
        shift2 = beta2 - scale2 * mean2

        # PReLU defaults (num_parameters=1, init=0.25).
        alpha1 = jnp.full((1,), 0.25, jnp.float32)
        alpha2 = jnp.full((1,), 0.25, jnp.float32)

        # Kernel-friendly weights: BN scales folded in.
        w1f = w1[:, :, 0, 0] * scale1[:, None]                     # (Cin, Cin)
        w2f = jnp.transpose(w2 * scale2[:, None, None, None],
                            (2, 3, 0, 1)).reshape(9, Cout, Cin)    # (9,Co,Ci)

        x = jax.random.normal(ks[10], (N, C, H, W), jnp.float32)

        out = conv_block_forward(x, w1f, shift1, alpha1, w2f, shift2, alpha2)
        out = jax.block_until_ready(out)

        ref = ref_forward(x, w1, w2, scale1, shift1, alpha1,
                          scale2, shift2, alpha2)
        assert out.shape == (N, Cout, H, W)
        err = float(jnp.max(jnp.abs(out - ref)))
        assert jnp.allclose(out, ref, rtol=1e-4, atol=1e-4), err

    key = jax.random.PRNGKey(0)
    k1, k2 = jax.random.split(key)
    run_case(k1, N=2, C=4, H=16, W=16)   # nb=1 path: 2 parallel grid steps
    run_case(k2, N=4, C=4, H=16, W=16)   # nb=2 path: batch packed in sublanes
    print("KERNEL_OK")
</pallas_src>

<mosaic_0001>
module attributes {stable_mosaic.version = 11 : i64} {
  func.func @convblock_kernel(%arg0: i32, %arg1: memref<1x4x256xf32, #tpu.memory_space<vmem>>, %arg2: memref<9x256xf32, #tpu.memory_space<vmem>>, %arg3: memref<4x4xf32, #tpu.memory_space<vmem>>, %arg4: memref<4x1xf32, #tpu.memory_space<vmem>>, %arg5: memref<9x4x4xf32, #tpu.memory_space<vmem>>, %arg6: memref<4x1xf32, #tpu.memory_space<vmem>>, %arg7: memref<1xf32, #tpu.memory_space<smem>>, %arg8: memref<1xf32, #tpu.memory_space<smem>>, %arg9: memref<1x4x256xf32, #tpu.memory_space<vmem>>) attributes {dimension_semantics = [#tpu.dimension_semantics<parallel>], iteration_bounds = array<i64: 2>, scalar_prefetch = 0 : i64, scratch_operands = 0 : i64, tpu.core_type = #tpu.core_type<tc>, window_params = [{transform_indices = @transform_0, window_bounds = array<i64: 1, 4, 256>}, {pipeline_mode = #tpu.pipeline_mode<synchronous>, transform_indices = @transform_1, window_bounds = array<i64: 9, 256>}, {pipeline_mode = #tpu.pipeline_mode<synchronous>, transform_indices = @transform_2, window_bounds = array<i64: 4, 4>}, {pipeline_mode = #tpu.pipeline_mode<synchronous>, transform_indices = @transform_3, window_bounds = array<i64: 4, 1>}, {pipeline_mode = #tpu.pipeline_mode<synchronous>, transform_indices = @transform_4, window_bounds = array<i64: 9, 4, 4>}, {pipeline_mode = #tpu.pipeline_mode<synchronous>, transform_indices = @transform_5, window_bounds = array<i64: 4, 1>}, {transform_indices = @transform_6, window_bounds = array<i64: 1>}, {transform_indices = @transform_7, window_bounds = array<i64: 1>}, {transform_indices = @transform_8, window_bounds = array<i64: 1, 4, 256>}]} {
    %c0 = arith.constant 0 : index
    %c0_0 = arith.constant 0 : index
    %c0_1 = arith.constant 0 : index
    %0 = vector.load %arg1[%c0, %c0_0, %c0_1] : memref<1x4x256xf32, #tpu.memory_space<vmem>>, vector<1x4x256xf32>
    %1 = vector.shape_cast %0 : vector<1x4x256xf32> to vector<4x256xf32>
    %c0_2 = arith.constant 0 : index
    %c0_3 = arith.constant 0 : index
    %2 = vector.load %arg3[%c0_2, %c0_3] : memref<4x4xf32, #tpu.memory_space<vmem>>, vector<4x1xf32>
    %3 = vector.extract_strided_slice %1 {offsets = [0, 0], sizes = [1, 256], strides = [1, 1]} : vector<4x256xf32> to vector<1x256xf32>
    %4 = vector.broadcast %2 : vector<4x1xf32> to vector<4x256xf32>
    %5 = vector.broadcast %3 : vector<1x256xf32> to vector<4x256xf32>
    %6 = arith.mulf %4, %5 : vector<4x256xf32>
    %c0_4 = arith.constant 0 : index
    %c1 = arith.constant 1 : index
    %7 = vector.load %arg3[%c0_4, %c1] : memref<4x4xf32, #tpu.memory_space<vmem>>, vector<4x1xf32>
    %8 = vector.extract_strided_slice %1 {offsets = [1, 0], sizes = [1, 256], strides = [1, 1]} : vector<4x256xf32> to vector<1x256xf32>
    %9 = vector.broadcast %7 : vector<4x1xf32> to vector<4x256xf32>
    %10 = vector.broadcast %8 : vector<1x256xf32> to vector<4x256xf32>
    %11 = arith.mulf %9, %10 : vector<4x256xf32>
    %12 = arith.addf %6, %11 : vector<4x256xf32>
    %c0_5 = arith.constant 0 : index
    %c2 = arith.constant 2 : index
    %13 = vector.load %arg3[%c0_5, %c2] : memref<4x4xf32, #tpu.memory_space<vmem>>, vector<4x1xf32>
    %14 = vector.extract_strided_slice %1 {offsets = [2, 0], sizes = [1, 256], strides = [1, 1]} : vector<4x256xf32> to vector<1x256xf32>
    %15 = vector.broadcast %13 : vector<4x1xf32> to vector<4x256xf32>
    %16 = vector.broadcast %14 : vector<1x256xf32> to vector<4x256xf32>
    %17 = arith.mulf %15, %16 : vector<4x256xf32>
    %18 = arith.addf %12, %17 : vector<4x256xf32>
    %c0_6 = arith.constant 0 : index
    %c3 = arith.constant 3 : index
    %19 = vector.load %arg3[%c0_6, %c3] : memref<4x4xf32, #tpu.memory_space<vmem>>, vector<4x1xf32>
    %20 = vector.extract_strided_slice %1 {offsets = [3, 0], sizes = [1, 256], strides = [1, 1]} : vector<4x256xf32> to vector<1x256xf32>
    %21 = vector.broadcast %19 : vector<4x1xf32> to vector<4x256xf32>
    %22 = vector.broadcast %20 : vector<1x256xf32> to vector<4x256xf32>
    %23 = arith.mulf %21, %22 : vector<4x256xf32>
    %24 = arith.addf %18, %23 : vector<4x256xf32>
    %c0_7 = arith.constant 0 : index
    %c0_8 = arith.constant 0 : index
    %25 = vector.load %arg4[%c0_7, %c0_8] : memref<4x1xf32, #tpu.memory_space<vmem>>, vector<4x1xf32>
    %26 = vector.broadcast %25 : vector<4x1xf32> to vector<4x256xf32>
    %27 = arith.addf %24, %26 : vector<4x256xf32>
    %c0_9 = arith.constant 0 : index
    %28 = memref.load %arg7[%c0_9] : memref<1xf32, #tpu.memory_space<smem>>
    %cst = arith.constant 0.000000e+00 : f32
    %29 = vector.broadcast %cst : f32 to vector<4x256xf32>
    %30 = arith.cmpf ogt, %27, %29 : vector<4x256xf32>
    %31 = vector.broadcast %28 : f32 to vector<4x256xf32>
    %32 = arith.mulf %31, %27 : vector<4x256xf32>
    %33 = arith.select %30, %27, %32 : vector<4x256xi1>, vector<4x256xf32>
    %c17_i32 = arith.constant 17 : i32
    %34 = tpu.dynamic_rotate %33 by %c17_i32 dim 1 : vector<4x256xf32>, i32 -> vector<4x256xf32>
    %c0_10 = arith.constant 0 : index
    %c0_11 = arith.constant 0 : index
    %35 = vector.load %arg2[%c0_10, %c0_11] : memref<9x256xf32, #tpu.memory_space<vmem>>, vector<1x256xf32>
    %36 = vector.broadcast %35 : vector<1x256xf32> to vector<4x256xf32>
    %37 = arith.mulf %34, %36 : vector<4x256xf32>
    %c0_12 = arith.constant 0 : index
    %c0_13 = arith.constant 0 : index
    %c0_14 = arith.constant 0 : index
    %38 = vector.load %arg5[%c0_12, %c0_13, %c0_14] : memref<9x4x4xf32, #tpu.memory_space<vmem>>, vector<1x4x1xf32>
    %39 = vector.shape_cast %38 : vector<1x4x1xf32> to vector<4x1xf32>
    %40 = vector.extract_strided_slice %37 {offsets = [0, 0], sizes = [1, 256], strides = [1, 1]} : vector<4x256xf32> to vector<1x256xf32>
    %41 = vector.broadcast %39 : vector<4x1xf32> to vector<4x256xf32>
    %42 = vector.broadcast %40 : vector<1x256xf32> to vector<4x256xf32>
    %43 = arith.mulf %41, %42 : vector<4x256xf32>
    %c0_15 = arith.constant 0 : index
    %c0_16 = arith.constant 0 : index
    %c1_17 = arith.constant 1 : index
    %44 = vector.load %arg5[%c0_15, %c0_16, %c1_17] : memref<9x4x4xf32, #tpu.memory_space<vmem>>, vector<1x4x1xf32>
    %45 = vector.shape_cast %44 : vector<1x4x1xf32> to vector<4x1xf32>
    %46 = vector.extract_strided_slice %37 {offsets = [1, 0], sizes = [1, 256], strides = [1, 1]} : vector<4x256xf32> to vector<1x256xf32>
    %47 = vector.broadcast %45 : vector<4x1xf32> to vector<4x256xf32>
    %48 = vector.broadcast %46 : vector<1x256xf32> to vector<4x256xf32>
    %49 = arith.mulf %47, %48 : vector<4x256xf32>
    %50 = arith.addf %43, %49 : vector<4x256xf32>
    %c0_18 = arith.constant 0 : index
    %c0_19 = arith.constant 0 : index
    %c2_20 = arith.constant 2 : index
    %51 = vector.load %arg5[%c0_18, %c0_19, %c2_20] : memref<9x4x4xf32, #tpu.memory_space<vmem>>, vector<1x4x1xf32>
    %52 = vector.shape_cast %51 : vector<1x4x1xf32> to vector<4x1xf32>
    %53 = vector.extract_strided_slice %37 {offsets = [2, 0], sizes = [1, 256], strides = [1, 1]} : vector<4x256xf32> to vector<1x256xf32>
    %54 = vector.broadcast %52 : vector<4x1xf32> to vector<4x256xf32>
    %55 = vector.broadcast %53 : vector<1x256xf32> to vector<4x256xf32>
    %56 = arith.mulf %54, %55 : vector<4x256xf32>
    %57 = arith.addf %50, %56 : vector<4x256xf32>
    %c0_21 = arith.constant 0 : index
    %c0_22 = arith.constant 0 : index
    %c3_23 = arith.constant 3 : index
    %58 = vector.load %arg5[%c0_21, %c0_22, %c3_23] : memref<9x4x4xf32, #tpu.memory_space<vmem>>, vector<1x4x1xf32>
    %59 = vector.shape_cast %58 : vector<1x4x1xf32> to vector<4x1xf32>
    %60 = vector.extract_strided_slice %37 {offsets = [3, 0], sizes = [1, 256], strides = [1, 1]} : vector<4x256xf32> to vector<1x256xf32>
    %61 = vector.broadcast %59 : vector<4x1xf32> to vector<4x256xf32>
    %62 = vector.broadcast %60 : vector<1x256xf32> to vector<4x256xf32>
    %63 = arith.mulf %61, %62 : vector<4x256xf32>
    %64 = arith.addf %57, %63 : vector<4x256xf32>
    %c16_i32 = arith.constant 16 : i32
    %65 = tpu.dynamic_rotate %33 by %c16_i32 dim 1 : vector<4x256xf32>, i32 -> vector<4x256xf32>
    %c1_24 = arith.constant 1 : index
    %c0_25 = arith.constant 0 : index
    %66 = vector.load %arg2[%c1_24, %c0_25] : memref<9x256xf32, #tpu.memory_space<vmem>>, vector<1x256xf32>
    %67 = vector.broadcast %66 : vector<1x256xf32> to vector<4x256xf32>
    %68 = arith.mulf %65, %67 : vector<4x256xf32>
    %c1_26 = arith.constant 1 : index
    %c0_27 = arith.constant 0 : index
    %c0_28 = arith.constant 0 : index
    %69 = vector.load %arg5[%c1_26, %c0_27, %c0_28] : memref<9x4x4xf32, #tpu.memory_space<vmem>>, vector<1x4x1xf32>
    %70 = vector.shape_cast %69 : vector<1x4x1xf32> to vector<4x1xf32>
    %71 = vector.extract_strided_slice %68 {offsets = [0, 0], sizes = [1, 256], strides = [1, 1]} : vector<4x256xf32> to vector<1x256xf32>
    %72 = vector.broadcast %70 : vector<4x1xf32> to vector<4x256xf32>
    %73 = vector.broadcast %71 : vector<1x256xf32> to vector<4x256xf32>
    %74 = arith.mulf %72, %73 : vector<4x256xf32>
    %c1_29 = arith.constant 1 : index
    %c0_30 = arith.constant 0 : index
    %c1_31 = arith.constant 1 : index
    %75 = vector.load %arg5[%c1_29, %c0_30, %c1_31] : memref<9x4x4xf32, #tpu.memory_space<vmem>>, vector<1x4x1xf32>
    %76 = vector.shape_cast %75 : vector<1x4x1xf32> to vector<4x1xf32>
    %77 = vector.extract_strided_slice %68 {offsets = [1, 0], sizes = [1, 256], strides = [1, 1]} : vector<4x256xf32> to vector<1x256xf32>
    %78 = vector.broadcast %76 : vector<4x1xf32> to vector<4x256xf32>
    %79 = vector.broadcast %77 : vector<1x256xf32> to vector<4x256xf32>
    %80 = arith.mulf %78, %79 : vector<4x256xf32>
    %81 = arith.addf %74, %80 : vector<4x256xf32>
    %c1_32 = arith.constant 1 : index
    %c0_33 = arith.constant 0 : index
    %c2_34 = arith.constant 2 : index
    %82 = vector.load %arg5[%c1_32, %c0_33, %c2_34] : memref<9x4x4xf32, #tpu.memory_space<vmem>>, vector<1x4x1xf32>
    %83 = vector.shape_cast %82 : vector<1x4x1xf32> to vector<4x1xf32>
    %84 = vector.extract_strided_slice %68 {offsets = [2, 0], sizes = [1, 256], strides = [1, 1]} : vector<4x256xf32> to vector<1x256xf32>
    %85 = vector.broadcast %83 : vector<4x1xf32> to vector<4x256xf32>
    %86 = vector.broadcast %84 : vector<1x256xf32> to vector<4x256xf32>
    %87 = arith.mulf %85, %86 : vector<4x256xf32>
    %88 = arith.addf %81, %87 : vector<4x256xf32>
    %c1_35 = arith.constant 1 : index
    %c0_36 = arith.constant 0 : index
    %c3_37 = arith.constant 3 : index
    %89 = vector.load %arg5[%c1_35, %c0_36, %c3_37] : memref<9x4x4xf32, #tpu.memory_space<vmem>>, vector<1x4x1xf32>
    %90 = vector.shape_cast %89 : vector<1x4x1xf32> to vector<4x1xf32>
    %91 = vector.extract_strided_slice %68 {offsets = [3, 0], sizes = [1, 256], strides = [1, 1]} : vector<4x256xf32> to vector<1x256xf32>
    %92 = vector.broadcast %90 : vector<4x1xf32> to vector<4x256xf32>
    %93 = vector.broadcast %91 : vector<1x256xf32> to vector<4x256xf32>
    %94 = arith.mulf %92, %93 : vector<4x256xf32>
    %95 = arith.addf %88, %94 : vector<4x256xf32>
    %96 = arith.addf %64, %95 : vector<4x256xf32>
    %c15_i32 = arith.constant 15 : i32
    %97 = tpu.dynamic_rotate %33 by %c15_i32 dim 1 : vector<4x256xf32>, i32 -> vector<4x256xf32>
    %c2_38 = arith.constant 2 : index
    %c0_39 = arith.constant 0 : index
    %98 = vector.load %arg2[%c2_38, %c0_39] : memref<9x256xf32, #tpu.memory_space<vmem>>, vector<1x256xf32>
    %99 = vector.broadcast %98 : vector<1x256xf32> to vector<4x256xf32>
    %100 = arith.mulf %97, %99 : vector<4x256xf32>
    %c2_40 = arith.constant 2 : index
    %c0_41 = arith.constant 0 : index
    %c0_42 = arith.constant 0 : index
    %101 = vector.load %arg5[%c2_40, %c0_41, %c0_42] : memref<9x4x4xf32, #tpu.memory_space<vmem>>, vector<1x4x1xf32>
    %102 = vector.shape_cast %101 : vector<1x4x1xf32> to vector<4x1xf32>
    %103 = vector.extract_strided_slice %100 {offsets = [0, 0], sizes = [1, 256], strides = [1, 1]} : vector<4x256xf32> to vector<1x256xf32>
    %104 = vector.broadcast %102 : vector<4x1xf32> to vector<4x256xf32>
    %105 = vector.broadcast %103 : vector<1x256xf32> to vector<4x256xf32>
    %106 = arith.mulf %104, %105 : vector<4x256xf32>
    %c2_43 = arith.constant 2 : index
    %c0_44 = arith.constant 0 : index
    %c1_45 = arith.constant 1 : index
    %107 = vector.load %arg5[%c2_43, %c0_44, %c1_45] : memref<9x4x4xf32, #tpu.memory_space<vmem>>, vector<1x4x1xf32>
    %108 = vector.shape_cast %107 : vector<1x4x1xf32> to vector<4x1xf32>
    %109 = vector.extract_strided_slice %100 {offsets = [1, 0], sizes = [1, 256], strides = [1, 1]} : vector<4x256xf32> to vector<1x256xf32>
    %110 = vector.broadcast %108 : vector<4x1xf32> to vector<4x256xf32>
    %111 = vector.broadcast %109 : vector<1x256xf32> to vector<4x256xf32>
    %112 = arith.mulf %110, %111 : vector<4x256xf32>
    %113 = arith.addf %106, %112 : vector<4x256xf32>
    %c2_46 = arith.constant 2 : index
    %c0_47 = arith.constant 0 : index
    %c2_48 = arith.constant 2 : index
    %114 = vector.load %arg5[%c2_46, %c0_47, %c2_48] : memref<9x4x4xf32, #tpu.memory_space<vmem>>, vector<1x4x1xf32>
    %115 = vector.shape_cast %114 : vector<1x4x1xf32> to vector<4x1xf32>
    %116 = vector.extract_strided_slice %100 {offsets = [2, 0], sizes = [1, 256], strides = [1, 1]} : vector<4x256xf32> to vector<1x256xf32>
    %117 = vector.broadcast %115 : vector<4x1xf32> to vector<4x256xf32>
    %118 = vector.broadcast %116 : vector<1x256xf32> to vector<4x256xf32>
    %119 = arith.mulf %117, %118 : vector<4x256xf32>
    %120 = arith.addf %113, %119 : vector<4x256xf32>
    %c2_49 = arith.constant 2 : index
    %c0_50 = arith.constant 0 : index
    %c3_51 = arith.constant 3 : index
    %121 = vector.load %arg5[%c2_49, %c0_50, %c3_51] : memref<9x4x4xf32, #tpu.memory_space<vmem>>, vector<1x4x1xf32>
    %122 = vector.shape_cast %121 : vector<1x4x1xf32> to vector<4x1xf32>
    %123 = vector.extract_strided_slice %100 {offsets = [3, 0], sizes = [1, 256], strides = [1, 1]} : vector<4x256xf32> to vector<1x256xf32>
    %124 = vector.broadcast %122 : vector<4x1xf32> to vector<4x256xf32>
    %125 = vector.broadcast %123 : vector<1x256xf32> to vector<4x256xf32>
    %126 = arith.mulf %124, %125 : vector<4x256xf32>
    %127 = arith.addf %120, %126 : vector<4x256xf32>
    %128 = arith.addf %96, %127 : vector<4x256xf32>
    %c1_i32 = arith.constant 1 : i32
    %129 = tpu.dynamic_rotate %33 by %c1_i32 dim 1 : vector<4x256xf32>, i32 -> vector<4x256xf32>
    %c3_52 = arith.constant 3 : index
    %c0_53 = arith.constant 0 : index
    %130 = vector.load %arg2[%c3_52, %c0_53] : memref<9x256xf32, #tpu.memory_space<vmem>>, vector<1x256xf32>
    %131 = vector.broadcast %130 : vector<1x256xf32> to vector<4x256xf32>
    %132 = arith.mulf %129, %131 : vector<4x256xf32>
    %c3_54 = arith.constant 3 : index
    %c0_55 = arith.constant 0 : index
    %c0_56 = arith.constant 0 : index
    %133 = vector.load %arg5[%c3_54, %c0_55, %c0_56] : memref<9x4x4xf32, #tpu.memory_space<vmem>>, vector<1x4x1xf32>
    %134 = vector.shape_cast %133 : vector<1x4x1xf32> to vector<4x1xf32>
    %135 = vector.extract_strided_slice %132 {offsets = [0, 0], sizes = [1, 256], strides = [1, 1]} : vector<4x256xf32> to vector<1x256xf32>
    %136 = vector.broadcast %134 : vector<4x1xf32> to vector<4x256xf32>
    %137 = vector.broadcast %135 : vector<1x256xf32> to vector<4x256xf32>
    %138 = arith.mulf %136, %137 : vector<4x256xf32>
    %c3_57 = arith.constant 3 : index
    %c0_58 = arith.constant 0 : index
    %c1_59 = arith.constant 1 : index
    %139 = vector.load %arg5[%c3_57, %c0_58, %c1_59] : memref<9x4x4xf32, #tpu.memory_space<vmem>>, vector<1x4x1xf32>
    %140 = vector.shape_cast %139 : vector<1x4x1xf32> to vector<4x1xf32>
    %141 = vector.extract_strided_slice %132 {offsets = [1, 0], sizes = [1, 256], strides = [1, 1]} : vector<4x256xf32> to vector<1x256xf32>
    %142 = vector.broadcast %140 : vector<4x1xf32> to vector<4x256xf32>
    %143 = vector.broadcast %141 : vector<1x256xf32> to vector<4x256xf32>
    %144 = arith.mulf %142, %143 : vector<4x256xf32>
    %145 = arith.addf %138, %144 : vector<4x256xf32>
    %c3_60 = arith.constant 3 : index
    %c0_61 = arith.constant 0 : index
    %c2_62 = arith.constant 2 : index
    %146 = vector.load %arg5[%c3_60, %c0_61, %c2_62] : memref<9x4x4xf32, #tpu.memory_space<vmem>>, vector<1x4x1xf32>
    %147 = vector.shape_cast %146 : vector<1x4x1xf32> to vector<4x1xf32>
    %148 = vector.extract_strided_slice %132 {offsets = [2, 0], sizes = [1, 256], strides = [1, 1]} : vector<4x256xf32> to vector<1x256xf32>
    %149 = vector.broadcast %147 : vector<4x1xf32> to vector<4x256xf32>
    %150 = vector.broadcast %148 : vector<1x256xf32> to vector<4x256xf32>
    %151 = arith.mulf %149, %150 : vector<4x256xf32>
    %152 = arith.addf %145, %151 : vector<4x256xf32>
    %c3_63 = arith.constant 3 : index
    %c0_64 = arith.constant 0 : index
    %c3_65 = arith.constant 3 : index
    %153 = vector.load %arg5[%c3_63, %c0_64, %c3_65] : memref<9x4x4xf32, #tpu.memory_space<vmem>>, vector<1x4x1xf32>
    %154 = vector.shape_cast %153 : vector<1x4x1xf32> to vector<4x1xf32>
    %155 = vector.extract_strided_slice %132 {offsets = [3, 0], sizes = [1, 256], strides = [1, 1]} : vector<4x256xf32> to vector<1x256xf32>
    %156 = vector.broadcast %154 : vector<4x1xf32> to vector<4x256xf32>
    %157 = vector.broadcast %155 : vector<1x256xf32> to vector<4x256xf32>
    %158 = arith.mulf %156, %157 : vector<4x256xf32>
    %159 = arith.addf %152, %158 : vector<4x256xf32>
    %160 = arith.addf %128, %159 : vector<4x256xf32>
    %c4 = arith.constant 4 : index
    %c0_66 = arith.constant 0 : index
    %c0_67 = arith.constant 0 : index
    %161 = vector.load %arg5[%c4, %c0_66, %c0_67] : memref<9x4x4xf32, #tpu.memory_space<vmem>>, vector<1x4x1xf32>
    %162 = vector.shape_cast %161 : vector<1x4x1xf32> to vector<4x1xf32>
    %163 = vector.extract_strided_slice %33 {offsets = [0, 0], sizes = [1, 256], strides = [1, 1]} : vector<4x256xf32> to vector<1x256xf32>
    %164 = vector.broadcast %162 : vector<4x1xf32> to vector<4x256xf32>
    %165 = vector.broadcast %163 : vector<1x256xf32> to vector<4x256xf32>
    %166 = arith.mulf %164, %165 : vector<4x256xf32>
    %c4_68 = arith.constant 4 : index
    %c0_69 = arith.constant 0 : index
    %c1_70 = arith.constant 1 : index
    %167 = vector.load %arg5[%c4_68, %c0_69, %c1_70] : memref<9x4x4xf32, #tpu.memory_space<vmem>>, vector<1x4x1xf32>
    %168 = vector.shape_cast %167 : vector<1x4x1xf32> to vector<4x1xf32>
    %169 = vector.extract_strided_slice %33 {offsets = [1, 0], sizes = [1, 256], strides = [1, 1]} : vector<4x256xf32> to vector<1x256xf32>
    %170 = vector.broadcast %168 : vector<4x1xf32> to vector<4x256xf32>
    %171 = vector.broadcast %169 : vector<1x256xf32> to vector<4x256xf32>
    %172 = arith.mulf %170, %171 : vector<4x256xf32>
    %173 = arith.addf %166, %172 : vector<4x256xf32>
    %c4_71 = arith.constant 4 : index
    %c0_72 = arith.constant 0 : index
    %c2_73 = arith.constant 2 : index
    %174 = vector.load %arg5[%c4_71, %c0_72, %c2_73] : memref<9x4x4xf32, #tpu.memory_space<vmem>>, vector<1x4x1xf32>
    %175 = vector.shape_cast %174 : vector<1x4x1xf32> to vector<4x1xf32>
    %176 = vector.extract_strided_slice %33 {offsets = [2, 0], sizes = [1, 256], strides = [1, 1]} : vector<4x256xf32> to vector<1x256xf32>
    %177 = vector.broadcast %175 : vector<4x1xf32> to vector<4x256xf32>
    %178 = vector.broadcast %176 : vector<1x256xf32> to vector<4x256xf32>
    %179 = arith.mulf %177, %178 : vector<4x256xf32>
    %180 = arith.addf %173, %179 : vector<4x256xf32>
    %c4_74 = arith.constant 4 : index
    %c0_75 = arith.constant 0 : index
    %c3_76 = arith.constant 3 : index
    %181 = vector.load %arg5[%c4_74, %c0_75, %c3_76] : memref<9x4x4xf32, #tpu.memory_space<vmem>>, vector<1x4x1xf32>
    %182 = vector.shape_cast %181 : vector<1x4x1xf32> to vector<4x1xf32>
    %183 = vector.extract_strided_slice %33 {offsets = [3, 0], sizes = [1, 256], strides = [1, 1]} : vector<4x256xf32> to vector<1x256xf32>
    %184 = vector.broadcast %182 : vector<4x1xf32> to vector<4x256xf32>
    %185 = vector.broadcast %183 : vector<1x256xf32> to vector<4x256xf32>
    %186 = arith.mulf %184, %185 : vector<4x256xf32>
    %187 = arith.addf %180, %186 : vector<4x256xf32>
    %188 = arith.addf %160, %187 : vector<4x256xf32>
    %c255_i32 = arith.constant 255 : i32
    %189 = tpu.dynamic_rotate %33 by %c255_i32 dim 1 : vector<4x256xf32>, i32 -> vector<4x256xf32>
    %c5 = arith.constant 5 : index
    %c0_77 = arith.constant 0 : index
    %190 = vector.load %arg2[%c5, %c0_77] : memref<9x256xf32, #tpu.memory_space<vmem>>, vector<1x256xf32>
    %191 = vector.broadcast %190 : vector<1x256xf32> to vector<4x256xf32>
    %192 = arith.mulf %189, %191 : vector<4x256xf32>
    %c5_78 = arith.constant 5 : index
    %c0_79 = arith.constant 0 : index
    %c0_80 = arith.constant 0 : index
    %193 = vector.load %arg5[%c5_78, %c0_79, %c0_80] : memref<9x4x4xf32, #tpu.memory_space<vmem>>, vector<1x4x1xf32>
    %194 = vector.shape_cast %193 : vector<1x4x1xf32> to vector<4x1xf32>
    %195 = vector.extract_strided_slice %192 {offsets = [0, 0], sizes = [1, 256], strides = [1, 1]} : vector<4x256xf32> to vector<1x256xf32>
    %196 = vector.broadcast %194 : vector<4x1xf32> to vector<4x256xf32>
    %197 = vector.broadcast %195 : vector<1x256xf32> to vector<4x256xf32>
    %198 = arith.mulf %196, %197 : vector<4x256xf32>
    %c5_81 = arith.constant 5 : index
    %c0_82 = arith.constant 0 : index
    %c1_83 = arith.constant 1 : index
    %199 = vector.load %arg5[%c5_81, %c0_82, %c1_83] : memref<9x4x4xf32, #tpu.memory_space<vmem>>, vector<1x4x1xf32>
    %200 = vector.shape_cast %199 : vector<1x4x1xf32> to vector<4x1xf32>
    %201 = vector.extract_strided_slice %192 {offsets = [1, 0], sizes = [1, 256], strides = [1, 1]} : vector<4x256xf32> to vector<1x256xf32>
    %202 = vector.broadcast %200 : vector<4x1xf32> to vector<4x256xf32>
    %203 = vector.broadcast %201 : vector<1x256xf32> to vector<4x256xf32>
    %204 = arith.mulf %202, %203 : vector<4x256xf32>
    %205 = arith.addf %198, %204 : vector<4x256xf32>
    %c5_84 = arith.constant 5 : index
    %c0_85 = arith.constant 0 : index
    %c2_86 = arith.constant 2 : index
    %206 = vector.load %arg5[%c5_84, %c0_85, %c2_86] : memref<9x4x4xf32, #tpu.memory_space<vmem>>, vector<1x4x1xf32>
    %207 = vector.shape_cast %206 : vector<1x4x1xf32> to vector<4x1xf32>
    %208 = vector.extract_strided_slice %192 {offsets = [2, 0], sizes = [1, 256], strides = [1, 1]} : vector<4x256xf32> to vector<1x256xf32>
    %209 = vector.broadcast %207 : vector<4x1xf32> to vector<4x256xf32>
    %210 = vector.broadcast %208 : vector<1x256xf32> to vector<4x256xf32>
    %211 = arith.mulf %209, %210 : vector<4x256xf32>
    %212 = arith.addf %205, %211 : vector<4x256xf32>
    %c5_87 = arith.constant 5 : index
    %c0_88 = arith.constant 0 : index
    %c3_89 = arith.constant 3 : index
    %213 = vector.load %arg5[%c5_87, %c0_88, %c3_89] : memref<9x4x4xf32, #tpu.memory_space<vmem>>, vector<1x4x1xf32>
    %214 = vector.shape_cast %213 : vector<1x4x1xf32> to vector<4x1xf32>
    %215 = vector.extract_strided_slice %192 {offsets = [3, 0], sizes = [1, 256], strides = [1, 1]} : vector<4x256xf32> to vector<1x256xf32>
    %216 = vector.broadcast %214 : vector<4x1xf32> to vector<4x256xf32>
    %217 = vector.broadcast %215 : vector<1x256xf32> to vector<4x256xf32>
    %218 = arith.mulf %216, %217 : vector<4x256xf32>
    %219 = arith.addf %212, %218 : vector<4x256xf32>
    %220 = arith.addf %188, %219 : vector<4x256xf32>
    %c241_i32 = arith.constant 241 : i32
    %221 = tpu.dynamic_rotate %33 by %c241_i32 dim 1 : vector<4x256xf32>, i32 -> vector<4x256xf32>
    %c6 = arith.constant 6 : index
    %c0_90 = arith.constant 0 : index
    %222 = vector.load %arg2[%c6, %c0_90] : memref<9x256xf32, #tpu.memory_space<vmem>>, vector<1x256xf32>
    %223 = vector.broadcast %222 : vector<1x256xf32> to vector<4x256xf32>
    %224 = arith.mulf %221, %223 : vector<4x256xf32>
    %c6_91 = arith.constant 6 : index
    %c0_92 = arith.constant 0 : index
    %c0_93 = arith.constant 0 : index
    %225 = vector.load %arg5[%c6_91, %c0_92, %c0_93] : memref<9x4x4xf32, #tpu.memory_space<vmem>>, vector<1x4x1xf32>
    %226 = vector.shape_cast %225 : vector<1x4x1xf32> to vector<4x1xf32>
    %227 = vector.extract_strided_slice %224 {offsets = [0, 0], sizes = [1, 256], strides = [1, 1]} : vector<4x256xf32> to vector<1x256xf32>
    %228 = vector.broadcast %226 : vector<4x1xf32> to vector<4x256xf32>
    %229 = vector.broadcast %227 : vector<1x256xf32> to vector<4x256xf32>
    %230 = arith.mulf %228, %229 : vector<4x256xf32>
    %c6_94 = arith.constant 6 : index
    %c0_95 = arith.constant 0 : index
    %c1_96 = arith.constant 1 : index
    %231 = vector.load %arg5[%c6_94, %c0_95, %c1_96] : memref<9x4x4xf32, #tpu.memory_space<vmem>>, vector<1x4x1xf32>
    %232 = vector.shape_cast %231 : vector<1x4x1xf32> to vector<4x1xf32>
    %233 = vector.extract_strided_slice %224 {offsets = [1, 0], sizes = [1, 256], strides = [1, 1]} : vector<4x256xf32> to vector<1x256xf32>
    %234 = vector.broadcast %232 : vector<4x1xf32> to vector<4x256xf32>
    %235 = vector.broadcast %233 : vector<1x256xf32> to vector<4x256xf32>
    %236 = arith.mulf %234, %235 : vector<4x256xf32>
    %237 = arith.addf %230, %236 : vector<4x256xf32>
    %c6_97 = arith.constant 6 : index
    %c0_98 = arith.constant 0 : index
    %c2_99 = arith.constant 2 : index
    %238 = vector.load %arg5[%c6_97, %c0_98, %c2_99] : memref<9x4x4xf32, #tpu.memory_space<vmem>>, vector<1x4x1xf32>
    %239 = vector.shape_cast %238 : vector<1x4x1xf32> to vector<4x1xf32>
    %240 = vector.extract_strided_slice %224 {offsets = [2, 0], sizes = [1, 256], strides = [1, 1]} : vector<4x256xf32> to vector<1x256xf32>
    %241 = vector.broadcast %239 : vector<4x1xf32> to vector<4x256xf32>
    %242 = vector.broadcast %240 : vector<1x256xf32> to vector<4x256xf32>
    %243 = arith.mulf %241, %242 : vector<4x256xf32>
    %244 = arith.addf %237, %243 : vector<4x256xf32>
    %c6_100 = arith.constant 6 : index
    %c0_101 = arith.constant 0 : index
    %c3_102 = arith.constant 3 : index
    %245 = vector.load %arg5[%c6_100, %c0_101, %c3_102] : memref<9x4x4xf32, #tpu.memory_space<vmem>>, vector<1x4x1xf32>
    %246 = vector.shape_cast %245 : vector<1x4x1xf32> to vector<4x1xf32>
    %247 = vector.extract_strided_slice %224 {offsets = [3, 0], sizes = [1, 256], strides = [1, 1]} : vector<4x256xf32> to vector<1x256xf32>
    %248 = vector.broadcast %246 : vector<4x1xf32> to vector<4x256xf32>
    %249 = vector.broadcast %247 : vector<1x256xf32> to vector<4x256xf32>
    %250 = arith.mulf %248, %249 : vector<4x256xf32>
    %251 = arith.addf %244, %250 : vector<4x256xf32>
    %252 = arith.addf %220, %251 : vector<4x256xf32>
    %c240_i32 = arith.constant 240 : i32
    %253 = tpu.dynamic_rotate %33 by %c240_i32 dim 1 : vector<4x256xf32>, i32 -> vector<4x256xf32>
    %c7 = arith.constant 7 : index
    %c0_103 = arith.constant 0 : index
    %254 = vector.load %arg2[%c7, %c0_103] : memref<9x256xf32, #tpu.memory_space<vmem>>, vector<1x256xf32>
    %255 = vector.broadcast %254 : vector<1x256xf32> to vector<4x256xf32>
    %256 = arith.mulf %253, %255 : vector<4x256xf32>
    %c7_104 = arith.constant 7 : index
    %c0_105 = arith.constant 0 : index
    %c0_106 = arith.constant 0 : index
    %257 = vector.load %arg5[%c7_104, %c0_105, %c0_106] : memref<9x4x4xf32, #tpu.memory_space<vmem>>, vector<1x4x1xf32>
    %258 = vector.shape_cast %257 : vector<1x4x1xf32> to vector<4x1xf32>
    %259 = vector.extract_strided_slice %256 {offsets = [0, 0], sizes = [1, 256], strides = [1, 1]} : vector<4x256xf32> to vector<1x256xf32>
    %260 = vector.broadcast %258 : vector<4x1xf32> to vector<4x256xf32>
    %261 = vector.broadcast %259 : vector<1x256xf32> to vector<4x256xf32>
    %262 = arith.mulf %260, %261 : vector<4x256xf32>
    %c7_107 = arith.constant 7 : index
    %c0_108 = arith.constant 0 : index
    %c1_109 = arith.constant 1 : index
    %263 = vector.load %arg5[%c7_107, %c0_108, %c1_109] : memref<9x4x4xf32, #tpu.memory_space<vmem>>, vector<1x4x1xf32>
    %264 = vector.shape_cast %263 : vector<1x4x1xf32> to vector<4x1xf32>
    %265 = vector.extract_strided_slice %256 {offsets = [1, 0], sizes = [1, 256], strides = [1, 1]} : vector<4x256xf32> to vector<1x256xf32>
    %266 = vector.broadcast %264 : vector<4x1xf32> to vector<4x256xf32>
    %267 = vector.broadcast %265 : vector<1x256xf32> to vector<4x256xf32>
    %268 = arith.mulf %266, %267 : vector<4x256xf32>
    %269 = arith.addf %262, %268 : vector<4x256xf32>
    %c7_110 = arith.constant 7 : index
    %c0_111 = arith.constant 0 : index
    %c2_112 = arith.constant 2 : index
    %270 = vector.load %arg5[%c7_110, %c0_111, %c2_112] : memref<9x4x4xf32, #tpu.memory_space<vmem>>, vector<1x4x1xf32>
    %271 = vector.shape_cast %270 : vector<1x4x1xf32> to vector<4x1xf32>
    %272 = vector.extract_strided_slice %256 {offsets = [2, 0], sizes = [1, 256], strides = [1, 1]} : vector<4x256xf32> to vector<1x256xf32>
    %273 = vector.broadcast %271 : vector<4x1xf32> to vector<4x256xf32>
    %274 = vector.broadcast %272 : vector<1x256xf32> to vector<4x256xf32>
    %275 = arith.mulf %273, %274 : vector<4x256xf32>
    %276 = arith.addf %269, %275 : vector<4x256xf32>
    %c7_113 = arith.constant 7 : index
    %c0_114 = arith.constant 0 : index
    %c3_115 = arith.constant 3 : index
    %277 = vector.load %arg5[%c7_113, %c0_114, %c3_115] : memref<9x4x4xf32, #tpu.memory_space<vmem>>, vector<1x4x1xf32>
    %278 = vector.shape_cast %277 : vector<1x4x1xf32> to vector<4x1xf32>
    %279 = vector.extract_strided_slice %256 {offsets = [3, 0], sizes = [1, 256], strides = [1, 1]} : vector<4x256xf32> to vector<1x256xf32>
    %280 = vector.broadcast %278 : vector<4x1xf32> to vector<4x256xf32>
    %281 = vector.broadcast %279 : vector<1x256xf32> to vector<4x256xf32>
    %282 = arith.mulf %280, %281 : vector<4x256xf32>
    %283 = arith.addf %276, %282 : vector<4x256xf32>
    %284 = arith.addf %252, %283 : vector<4x256xf32>
    %c239_i32 = arith.constant 239 : i32
    %285 = tpu.dynamic_rotate %33 by %c239_i32 dim 1 : vector<4x256xf32>, i32 -> vector<4x256xf32>
    %c8 = arith.constant 8 : index
    %c0_116 = arith.constant 0 : index
    %286 = vector.load %arg2[%c8, %c0_116] : memref<9x256xf32, #tpu.memory_space<vmem>>, vector<1x256xf32>
    %287 = vector.broadcast %286 : vector<1x256xf32> to vector<4x256xf32>
    %288 = arith.mulf %285, %287 : vector<4x256xf32>
    %c8_117 = arith.constant 8 : index
    %c0_118 = arith.constant 0 : index
    %c0_119 = arith.constant 0 : index
    %289 = vector.load %arg5[%c8_117, %c0_118, %c0_119] : memref<9x4x4xf32, #tpu.memory_space<vmem>>, vector<1x4x1xf32>
    %290 = vector.shape_cast %289 : vector<1x4x1xf32> to vector<4x1xf32>
    %291 = vector.extract_strided_slice %288 {offsets = [0, 0], sizes = [1, 256], strides = [1, 1]} : vector<4x256xf32> to vector<1x256xf32>
    %292 = vector.broadcast %290 : vector<4x1xf32> to vector<4x256xf32>
    %293 = vector.broadcast %291 : vector<1x256xf32> to vector<4x256xf32>
    %294 = arith.mulf %292, %293 : vector<4x256xf32>
    %c8_120 = arith.constant 8 : index
    %c0_121 = arith.constant 0 : index
    %c1_122 = arith.constant 1 : index
    %295 = vector.load %arg5[%c8_120, %c0_121, %c1_122] : memref<9x4x4xf32, #tpu.memory_space<vmem>>, vector<1x4x1xf32>
    %296 = vector.shape_cast %295 : vector<1x4x1xf32> to vector<4x1xf32>
    %297 = vector.extract_strided_slice %288 {offsets = [1, 0], sizes = [1, 256], strides = [1, 1]} : vector<4x256xf32> to vector<1x256xf32>
    %298 = vector.broadcast %296 : vector<4x1xf32> to vector<4x256xf32>
    %299 = vector.broadcast %297 : vector<1x256xf32> to vector<4x256xf32>
    %300 = arith.mulf %298, %299 : vector<4x256xf32>
    %301 = arith.addf %294, %300 : vector<4x256xf32>
    %c8_123 = arith.constant 8 : index
    %c0_124 = arith.constant 0 : index
    %c2_125 = arith.constant 2 : index
    %302 = vector.load %arg5[%c8_123, %c0_124, %c2_125] : memref<9x4x4xf32, #tpu.memory_space<vmem>>, vector<1x4x1xf32>
    %303 = vector.shape_cast %302 : vector<1x4x1xf32> to vector<4x1xf32>
    %304 = vector.extract_strided_slice %288 {offsets = [2, 0], sizes = [1, 256], strides = [1, 1]} : vector<4x256xf32> to vector<1x256xf32>
    %305 = vector.broadcast %303 : vector<4x1xf32> to vector<4x256xf32>
    %306 = vector.broadcast %304 : vector<1x256xf32> to vector<4x256xf32>
    %307 = arith.mulf %305, %306 : vector<4x256xf32>
    %308 = arith.addf %301, %307 : vector<4x256xf32>
    %c8_126 = arith.constant 8 : index
    %c0_127 = arith.constant 0 : index
    %c3_128 = arith.constant 3 : index
    %309 = vector.load %arg5[%c8_126, %c0_127, %c3_128] : memref<9x4x4xf32, #tpu.memory_space<vmem>>, vector<1x4x1xf32>
    %310 = vector.shape_cast %309 : vector<1x4x1xf32> to vector<4x1xf32>
    %311 = vector.extract_strided_slice %288 {offsets = [3, 0], sizes = [1, 256], strides = [1, 1]} : vector<4x256xf32> to vector<1x256xf32>
    %312 = vector.broadcast %310 : vector<4x1xf32> to vector<4x256xf32>
    %313 = vector.broadcast %311 : vector<1x256xf32> to vector<4x256xf32>
    %314 = arith.mulf %312, %313 : vector<4x256xf32>
    %315 = arith.addf %308, %314 : vector<4x256xf32>
    %316 = arith.addf %284, %315 : vector<4x256xf32>
    %c0_129 = arith.constant 0 : index
    %c0_130 = arith.constant 0 : index
    %317 = vector.load %arg6[%c0_129, %c0_130] : memref<4x1xf32, #tpu.memory_space<vmem>>, vector<4x1xf32>
    %318 = vector.broadcast %317 : vector<4x1xf32> to vector<4x256xf32>
    %319 = arith.addf %316, %318 : vector<4x256xf32>
    %c0_131 = arith.constant 0 : index
    %320 = memref.load %arg8[%c0_131] : memref<1xf32, #tpu.memory_space<smem>>
    %cst_132 = arith.constant 0.000000e+00 : f32
    %321 = vector.broadcast %cst_132 : f32 to vector<4x256xf32>
    %322 = arith.cmpf ogt, %319, %321 : vector<4x256xf32>
    %323 = vector.broadcast %320 : f32 to vector<4x256xf32>
    %324 = arith.mulf %323, %319 : vector<4x256xf32>
    %325 = arith.select %322, %319, %324 : vector<4x256xi1>, vector<4x256xf32>
    %326 = arith.addf %325, %1 : vector<4x256xf32>
    %c0_133 = arith.constant 0 : index
    %c0_134 = arith.constant 0 : index
    %c0_135 = arith.constant 0 : index
    %327 = vector.load %arg9[%c0_133, %c0_134, %c0_135] : memref<1x4x256xf32, #tpu.memory_space<vmem>>, vector<1x4x256xf32>
    %328 = vector.shape_cast %327 : vector<1x4x256xf32> to vector<4x256xf32>
    %329 = vector.shape_cast %326 : vector<4x256xf32> to vector<1x4x256xf32>
    tpu.vector_store %arg9[%c0_133, %c0_134, %c0_135], %329 {strides = array<i32>} : memref<1x4x256xf32, #tpu.memory_space<vmem>>, vector<1x4x256xf32>,
    return
  }
  func.func @transform_0(%arg0: i32) -> (i32, i32, i32) {
    %c0_i32 = arith.constant 0 : i32
    %c0_i32_0 = arith.constant 0 : i32
    %c0_i32_1 = arith.constant 0 : i32
    return %arg0, %c0_i32, %c0_i32_0 : i32, i32, i32
  }
  func.func @transform_1(%arg0: i32) -> (i32, i32) {
    %c0_i32 = arith.constant 0 : i32
    %c0_i32_0 = arith.constant 0 : i32
    %c0_i32_1 = arith.constant 0 : i32
    return %c0_i32, %c0_i32_0 : i32, i32
  }
  func.func @transform_2(%arg0: i32) -> (i32, i32) {
    %c0_i32 = arith.constant 0 : i32
    %c0_i32_0 = arith.constant 0 : i32
    %c0_i32_1 = arith.constant 0 : i32
    return %c0_i32, %c0_i32_0 : i32, i32
  }
  func.func @transform_3(%arg0: i32) -> (i32, i32) {
    %c0_i32 = arith.constant 0 : i32
    %c0_i32_0 = arith.constant 0 : i32
    %c0_i32_1 = arith.constant 0 : i32
    return %c0_i32, %c0_i32_0 : i32, i32
  }
  func.func @transform_4(%arg0: i32) -> (i32, i32, i32) {
    %c0_i32 = arith.constant 0 : i32
    %c0_i32_0 = arith.constant 0 : i32
    %c0_i32_1 = arith.constant 0 : i32
    %c0_i32_2 = arith.constant 0 : i32
    return %c0_i32, %c0_i32_0, %c0_i32_1 : i32, i32, i32
  }
  func.func @transform_5(%arg0: i32) -> (i32, i32) {
    %c0_i32 = arith.constant 0 : i32
    %c0_i32_0 = arith.constant 0 : i32
    %c0_i32_1 = arith.constant 0 : i32
    return %c0_i32, %c0_i32_0 : i32, i32
  }
  func.func @transform_6(%arg0: i32) -> i32 {
    %c0_i32 = arith.constant 0 : i32
    %c0_i32_0 = arith.constant 0 : i32
    return %c0_i32 : i32
  }
  func.func @transform_7(%arg0: i32) -> i32 {
    %c0_i32 = arith.constant 0 : i32
    %c0_i32_0 = arith.constant 0 : i32
    return %c0_i32 : i32
  }
  func.func @transform_8(%arg0: i32) -> (i32, i32, i32) {
    %c0_i32 = arith.constant 0 : i32
    %c0_i32_0 = arith.constant 0 : i32
    %c0_i32_1 = arith.constant 0 : i32
    return %arg0, %c0_i32, %c0_i32_0 : i32, i32, i32
  }
}

</mosaic_0001>

<bundles_post_ra>
// kernel: tpu_custom_call.1
= control target key start
LH: loop header
LB: loop body
LE: loop exit
PB: predicated region body
PF: predicated region fallthrough
CT: control target
= control target key end

     0   :  { %s2127_s0 = inlined_call_operand.vmem [shape: f32[2,4,256], index: 0, kind: input, shape index: {}]   ;;  %s2128_s1 = inlined_call_operand.vmem [shape: f32[9,256], index: 1, kind: input, shape index: {}]   ;;  %s2129_s2 = inlined_call_operand.vmem [shape: f32[4,4], index: 2, kind: input, shape index: {}]   ;;  %s2130_s3 = inlined_call_operand.vmem [shape: f32[4,1], index: 3, kind: input, shape index: {}]   ;;  %s2131_s4 = inlined_call_operand.vmem [shape: f32[9,4,4], index: 4, kind: input, shape index: {}]   ;;  %s2132_s5 = inlined_call_operand.vmem [shape: f32[4,1], index: 5, kind: input, shape index: {}]   ;;  %s2133_s6 = inlined_call_operand.<no memory space> [shape: f32[1], index: 6, kind: input, shape index: {}]   ;;  %s2134_s7 = inlined_call_operand.<no memory space> [shape: f32[1], index: 7, kind: input, shape index: {}]   ;;  %s2135_s8 = inlined_call_operand.hbm [shape: f32[2,4,256], index: 8, kind: output, shape index: {}]  }
   0x1   :  { %13 = sst [smem:[#allocation2]] %s2133_s6 }
   0x2   :  { %14 = sst [smem:[#allocation3]] %s2134_s7 }
   0x3   :  { %15 = vsyncpa [#allocation5], 0 }
   0x4   :  { %17 = vsyncpa [#allocation5 + $0x1], 0  ;;  %s1538_s9 = smov 0   ;;  %s1540_s10 = smov 0  }
   0x5   :  { %s1542_s11 = smov 0   ;;  %s1544_s12 = smov 0  }
   0x6 LB: > { %s1559_s6 = sadd.s32 4294967295, %s1472_s12   ;;  %s1304_s7 = sadd.s32 4294967294, %s1472_s12   ;;  %s1472_s12 = sphi %s1544_s12, %s2161_s12   ;;  %s1468_s11 = sphi %s1542_s11, %s2160_s11   ;;  %s1464_s10 = sphi %s1540_s10, %s2159_s10   ;;  %s1460_s9 = sphi %s1538_s9, %s2158_s9  }
   0x7   : > { %s1563_s13 = sadd.s32 1, %s1472_s12   ;;  %s203_s14 = sadd.s32 1, %s1468_s11 }
   0x8   : > { %s200_s15 = ssub.s32 %s1472_s12, %s1563_s13  ;;  %p213_p0 = scmp.ne.s32.totalorder %s1468_s11, %s1464_s10 }
   0x9   : > { %p201_p1 = scmp.eq.s32.totalorder %s200_s15, 0  ;;  %p214_p2 = scmp.eq.s32.totalorder %s1559_s6, 1 }
   0xa   : > { %p219_p3 = scmp.ne.s32.totalorder %s1464_s10, %s1460_s9  ;;  %p220_p4 = scmp.eq.s32.totalorder %s1304_s7, 1 }
   0xb   : > { %s1574_s16 = scalar_select %p201_p1, %s1468_s11, %s203_s14  }
   0xc   : > { %p1576_p5 = por %p214_p2, %p213_p0  ;;  %p1580_p6 = por %p220_p4, %p219_p3 }
   0xd   : > { %p1307_p7 = scmp.ge.s32.totalorder %s1472_s12, 1  ;;  %p267_p8 = scmp.lt.s32.totalorder %s1472_s12, 3 }
   0xf   : > { %p268_p9 = pnand %p1307_p7, %p267_p8 }
  0x11   : > { %271 = sbr.rel (%p268_p9) target bundleno = 382 (0x17e), region = 52 }
  0x16   : > { %v307_v0 = vld [vmem:[%s2129_s2] sm:$0xf]  ;;  %v1474_v1 = vmov 2   ;;  %v1475_v2 = vmov 0   ;;  %v1476_v3 = vmov 3   ;;  %v1477_v4 = vmov 1  }
  0x17   : > { %1386 = vset.pattern.permute.xlu1 %v1474_v1  ;;  %1384 = vset.pattern.permute.xlu0 %v1475_v2  ;;  %v412_v5 = vld [vmem:[%s2130_s3] sm:$0xf]  ;;  %v1312_v7 = vld [vmem:[%s2131_s4 + $0x4] sm:$0xf]  ;;  %v1314_v8 = vld [vmem:[%s2131_s4 + $0x8] sm:$0xf]  ;;  %v314_v15 = vlaneseq }
  0x18   : > { %361 = vperm.xlu1 %1386, %v307_v0   ;;  %310 = vperm.xlu0 %1384, %v307_v0   ;;  %v451_v6 = vld [vmem:[%s2131_s4] sm:$0xf]  ;;  %v1316_v9 = vld [vmem:[%s2131_s4 + $0xc] sm:$0xf]  ;;  %v1612_v10 = vld [vmem:[%s2131_s4 + $0x14] sm:$0xf] }
  0x19   : > { %v1618_v11 = vld [vmem:[%s2131_s4 + $0x18] sm:$0xf]  ;;  %v1624_v12 = vld [vmem:[%s2131_s4 + $0x1c] sm:$0xf]  ;;  %v1317_v13 = vld [vmem:[%s2131_s4 + $0x10] sm:$0xf] }
  0x1a   : > { %v1633_v14 = vld [vmem:[%s2131_s4 + $0x20] sm:$0xf]  ;;  %p301_p10 = scmp.lt.s32.totalorder %s1559_s6, 1  ;;  %v315_v16 = vshrl.u32 %v314_v15, 7  ;;  %s420_s7 = sld [smem:[#allocation2]] }
  0x1b   : > { %s1478_s14 = smov 17   ;;  %s1479_s15 = smov 16  }
  0x1c   : > { %1387 = vset.pattern.permute.xlu1 %v1476_v3  ;;  %1385 = vset.pattern.permute.xlu0 %v1477_v4  ;;  %s302_s26 = scalar_select %p301_p10, %s1559_s6, 1  ;;  %v1653_v17 = vsub.s32 0, %v315_v16  ;;  %v320_v18 = vsub.s32 4, %v315_v16  ;;  %v1655_v19 = vsub.s32 1, %v315_v16  ;;  %v344_v20 = vsub.s32 5, %v315_v16 }
  0x1d   : > { %387 = vperm.xlu1 %1387, %v307_v0   ;;  %335 = vperm.xlu0 %1385, %v307_v0   ;;  %v1657_v21 = vsub.s32 2, %v315_v16  ;;  %v370_v23 = vsub.s32 6, %v315_v16  ;;  %v1661_v24 = vsub.s32 3, %v315_v16  ;;  %v396_v25 = vsub.s32 7, %v315_v16  ;;  %s1480_s19 = smov 15   ;;  %s1481_s20 = smov 1  }
  0x1e   : > { %s1331_s27 = sshll.u32 %s302_s26, 3  ;;  %s1482_s21 = smov 127  }
  0x1f   : > { %s305_s30 = scalar_lea.vmem %s2127_s0, %s1331_s27  ;;  %s1483_s22 = smov 113  }
  0x20   : > { %v1659_v22 = vld [vmem:[%s305_s30] sm:$0xff]  ;;  %v423_v62 = vstv %s420_s7  ;;  %s1484_s23 = smov 112   ;;  %s1485_s24 = smov 111  }
  0x21   : > { %1388 = vset.pattern.permute.xlu1 %v1475_v2  ;;  %1391 = vset.pattern.permute.xlu0 %v1476_v3  ;;  %2143 = vst [vmem:[#allocation7_spill] sm:$0xff] %v1659_v22  ;;  %v317_v26 = vrot.slane %v1659_v22, %v1653_v17  ;;  %v321_v27 = vrot.slane %v1659_v22, %v320_v18  ;;  %s1213_s28 = sld [smem:[#allocation3]]  ;;  %s298_s29 = sand.u32 1, %s1464_s10  }
  0x22   : > { %415 = vperm.xlu1 %1388, %v412_v5   ;;  %500 = vperm.xlu0 %1391, %v451_v6   ;;  %v341_v28 = vrot.slane %v1659_v22, %v1655_v19  ;;  %v345_v29 = vrot.slane %v1659_v22, %v344_v20  ;;  %v367_v30 = vrot.slane %v1659_v22, %v1657_v21  ;;  %s1308_s30 = sshll.u32 %s298_s29, 3  ;;  %s1332_s7 = sshll.u32 %s1559_s6, 7 }
  0x23   : > { %v371_v31 = vrot.slane %v1659_v22, %v370_v23  ;;  %v393_v34 = vrot.slane %v1659_v22, %v1661_v24  ;;  %v397_v35 = vrot.slane %v1659_v22, %v396_v25  ;;  %v327_v36 = vrot.slane %v317_v26, %v1653_v17 }
  0x24   : > { %v331_v37 = vrot.slane %v321_v27, %v1653_v17  ;;  %v351_v38 = vrot.slane %v341_v28, %v1655_v19  ;;  %v355_v39 = vrot.slane %v345_v29, %v1655_v19  ;;  %v377_v40 = vrot.slane %v367_v30, %v1657_v21 }
  0x25   : > { %v381_v41 = vrot.slane %v371_v31, %v1657_v21  ;;  %v403_v42 = vrot.slane %v393_v34, %v1661_v24  ;;  %v407_v43 = vrot.slane %v397_v35, %v1661_v24 }
  0x26   : > { %1389 = vset.pattern.permute.xlu1 %v1477_v4  ;;  %587 = vperm.xlu0 %1391, %v1312_v7  }
  0x27   : > { %468 = vperm.xlu1 %1389, %v451_v6  }
  0x2a   : > { %676 = vperm.xlu0 %1391, %v1314_v8  }
  0x2b   : > { %1390 = vset.pattern.permute.xlu1 %v1474_v1 }
  0x2c   : > { %484 = vperm.xlu1 %1390, %v451_v6  }
  0x2e   : > { %765 = vperm.xlu0 %1391, %v1316_v9  }
  0x30   : > { %1392 = vset.pattern.permute.xlu1 %v1477_v4 }
  0x31   : > { %555 = vperm.xlu1 %1392, %v1312_v7  }
  0x32   : > { %1398 = vset.pattern.permute.xlu0 %v1475_v2 }
  0x33   : > { %454 = vperm.xlu0 %1398, %v451_v6  }
  0x35   : > { %1393 = vset.pattern.permute.xlu1 %v1474_v1 }
  0x36   : > { %571 = vperm.xlu1 %1393, %v1312_v7  }
  0x37   : > { %541 = vperm.xlu0 %1398, %v1312_v7  }
  0x3a   : > { %1394 = vset.pattern.permute.xlu1 %v1477_v4 }
  0x3b   : > { %644 = vperm.xlu1 %1394, %v1314_v8   ;;  %630 = vperm.xlu0 %1398, %v1314_v8  }
  0x3f   : > { %1395 = vset.pattern.permute.xlu1 %v1474_v1  ;;  %719 = vperm.xlu0 %1398, %v1316_v9  }
  0x40   : > { %660 = vperm.xlu1 %1395, %v1314_v8  }
  0x43   : > { %875 = vperm.xlu0 %1398, %v1612_v10  }
  0x44   : > { %1396 = vset.pattern.permute.xlu1 %v1477_v4 }
  0x45   : > { %733 = vperm.xlu1 %1396, %v1316_v9  }
  0x47   : > { %964 = vperm.xlu0 %1398, %v1618_v11  }
  0x49   : > { %1397 = vset.pattern.permute.xlu1 %v1474_v1 }
  0x4a   : > { %749 = vperm.xlu1 %1397, %v1316_v9  }
  0x4b   : > { %1053 = vperm.xlu0 %1398, %v1624_v12  }
  0x4e   : > { %1399 = vset.pattern.permute.xlu1 %v1475_v2 }
  0x4f   : > { %786 = vperm.xlu1 %1399, %v1317_v13   ;;  %1142 = vperm.xlu0 %1398, %v1633_v14  }
  0x53   : > { %1400 = vset.pattern.permute.xlu1 %v1477_v4  ;;  %1406 = vset.pattern.permute.xlu0 %v1474_v1 }
  0x54   : > { %800 = vperm.xlu1 %1400, %v1317_v13   ;;  %816 = vperm.xlu0 %1406, %v1317_v13  }
  0x58   : > { %889 = vperm.xlu1 %1400, %v1612_v10  }
  0x5c   : > { %1401 = vset.pattern.permute.xlu1 %v1476_v3 }
  0x5d   : > { %832 = vperm.xlu1 %1401, %v1317_v13  }
  0x61   : > { %1402 = vset.pattern.permute.xlu1 %v1477_v4 }
  0x62   : > { %978 = vperm.xlu1 %1402, %v1618_v11  }
  0x66   : > { %1403 = vset.pattern.permute.xlu1 %v1476_v3 }
  0x67   : > { %921 = vperm.xlu1 %1403, %v1612_v10  }
  0x6b   : > { %1404 = vset.pattern.permute.xlu1 %v1477_v4 }
  0x6c   : > { %1067 = vperm.xlu1 %1404, %v1624_v12  }
  0x70   : > { %1405 = vset.pattern.permute.xlu1 %v1476_v3 }
  0x71   : > { %1010 = vperm.xlu1 %1405, %v1618_v11  }
  0x75   : > { %1407 = vset.pattern.permute.xlu1 %v1477_v4 }
  0x76   : > { %1156 = vperm.xlu1 %1407, %v1633_v14  }
  0x7a   : > { %1408 = vset.pattern.permute.xlu1 %v1476_v3 }
  0x93   : > { %v311_v32 = vpop.permute.xlu0 %310  ;;  %v362_v33 = vpop.permute.xlu1 %361 }
  0x94   : > { %v332_v46 = vmul.f32 %v327_v36, %v311_v32  ;;  %v333_v47 = vmul.f32 %v331_v37, %v311_v32  ;;  %v382_v50 = vmul.f32 %v377_v40, %v362_v33  ;;  %v383_v51 = vmul.f32 %v381_v41, %v362_v33 }
  0x98   : > { %v336_v44 = vpop.permute.xlu0 %335  ;;  %v388_v45 = vpop.permute.xlu1 %387 }
  0x99   : > { %v356_v48 = vmul.f32 %v351_v38, %v336_v44  ;;  %v357_v49 = vmul.f32 %v355_v39, %v336_v44  ;;  %v408_v54 = vmul.f32 %v403_v42, %v388_v45  ;;  %v409_v55 = vmul.f32 %v407_v43, %v388_v45 }
  0x9b   : > { %v358_v52 = vadd.f32 %v356_v48, %v332_v46  ;;  %v359_v53 = vadd.f32 %v357_v49, %v333_v47 }
  0x9d   : > { %v1683_v56 = vpop.permute.xlu0 %500  ;;  %v384_v57 = vadd.f32 %v382_v50, %v358_v52  ;;  %v385_v58 = vadd.f32 %v383_v51, %v359_v53  ;;  %v416_v59 = vpop.permute.xlu1 %415 }
  0x9f   : > { %v410_v60 = vadd.f32 %v408_v54, %v384_v57  ;;  %v411_v61 = vadd.f32 %v409_v55, %v385_v58 }
  0xa1   : > { %v418_v63 = vadd.f32 %v416_v59, %v410_v60  ;;  %v419_v0 = vadd.f32 %v416_v59, %v411_v61  ;;  %v1685_v1 = vpop.permute.xlu0 %587  ;;  %v1205_v61 = vld [vmem:[%s2132_s5] sm:$0xf] }
  0xa2   : > { %v1687_v3 = vpop.permute.xlu1 %468 }
  0xa3   : > { %vm421_vm0 = vcmp.gt.f32.partialorder %v418_v63, 0.0  ;;  %vm422_vm1 = vcmp.gt.f32.partialorder %v419_v0, 0.0  ;;  %v424_v4 = vmul.f32 %v423_v62, %v418_v63  ;;  %v425_v5 = vmul.f32 %v423_v62, %v419_v0 }
  0xa5   : > { %v1689_v6 = vsel %vm421_vm0, %v418_v63, %v424_v4  ;;  %v1691_v7 = vsel %vm422_vm1, %v419_v0, %v425_v5  ;;  %v1693_v8 = vpop.permute.xlu0 %676 }
  0xa6   : > { %430 = vrot.lane.b32.xlu1 %v1691_v7, %s1478_s14  ;;  %428 = vrot.lane.b32.xlu0 %v1689_v6, %s1478_s14  ;;  %v792_v32 = vrot.slane %v1689_v6, %v1653_v17  ;;  %v796_v33 = vrot.slane %v1691_v7, %v1653_v17  ;;  %v806_v38 = vrot.slane %v1689_v6, %v1655_v19  ;;  %s300_s14 = scalar_lea.vmem [#allocation4], %s1308_s30 }
  0xa7   : > { %v1697_v9 = vpop.permute.xlu1 %484  ;;  %v810_v39 = vrot.slane %v1691_v7, %v1655_v19  ;;  %v822_v44 = vrot.slane %v1689_v6, %v1657_v21  ;;  %v826_v45 = vrot.slane %v1691_v7, %v1657_v21  ;;  %v838_v53 = vrot.slane %v1689_v6, %v1661_v24 }
  0xa8   : > { %v842_v54 = vrot.slane %v1691_v7, %v1661_v24 }
  0xa9   : > { %v1699_v13 = vpop.permute.xlu0 %765 }
  0xaa   : > { %515 = vrot.lane.b32.xlu1 %v1689_v6, %s1479_s15  ;;  %905 = vperm.xlu0 %1406, %v1612_v10  }
  0xac   : > { %v1703_v16 = vpop.permute.xlu1 %555 }
  0xae   : > { %517 = vrot.lane.b32.xlu1 %v1691_v7, %s1479_s15  ;;  %v1706_v18 = vpop.permute.xlu0 %454  ;;  %994 = vperm.xlu0 %1406, %v1618_v11   ;;  %s1245_s15 = sshll.u32 %s300_s14, 4  ;;  %s1246_s15 = int_to_ptr.vmem [resolvable:$true] %s1245_s15 }
  0xb1   : > { %v1709_v20 = vpop.permute.xlu1 %571 }
  0xb2   : > { %604 = vrot.lane.b32.xlu1 %v1689_v6, %s1480_s19  ;;  %v1712_v23 = vpop.permute.xlu0 %541  ;;  %1083 = vperm.xlu0 %1406, %v1624_v12  }
  0xb6   : > { %606 = vrot.lane.b32.xlu1 %v1691_v7, %s1480_s19  ;;  %v1716_v10 = vpop.permute.xlu0 %630  ;;  %v1718_v25 = vpop.permute.xlu1 %644  ;;  %1172 = vperm.xlu0 %1406, %v1633_v14  }
  0xba   : > { %693 = vrot.lane.b32.xlu1 %v1689_v6, %s1481_s20  ;;  %v1722_v11 = vpop.permute.xlu0 %719  ;;  %1410 = vset.pattern.permute.xlu0 %v1475_v2 }
  0xbb   : > { %v1725_v26 = vpop.permute.xlu1 %660 }
  0xbe   : > { %695 = vrot.lane.b32.xlu1 %v1691_v7, %s1481_s20  ;;  %v1728_v27 = vpop.permute.xlu0 %875 }
  0xc0   : > { %v1730_v28 = vpop.permute.xlu1 %733 }
  0xc2   : > { %849 = vrot.lane.b32.xlu1 %v1689_v6, %s1482_s21  ;;  %v1733_v29 = vpop.permute.xlu0 %964 }
  0xc5   : > { %v1735_v30 = vpop.permute.xlu1 %749 }
  0xc6   : > { %851 = vrot.lane.b32.xlu1 %v1691_v7, %s1482_s21  ;;  %v1738_v31 = vpop.permute.xlu0 %1053  ;;  %s1243_s21 = scalar_lea.hbm %s2135_s8, %s1332_s7 }
  0xca   : > { %v787_v34 = vpop.permute.xlu1 %786  ;;  %938 = vrot.lane.b32.xlu1 %v1689_v6, %s1483_s22  ;;  %v1745_v35 = vpop.permute.xlu0 %1142 }
  0xcb   : > { %2144 = vst [vmem:[#allocation8_spill] sm:$0xff] %v1745_v35  ;;  %v797_v36 = vmul.f32 %v792_v32, %v787_v34  ;;  %v798_v37 = vmul.f32 %v796_v33, %v787_v34 }
  0xce   : > { %940 = vrot.lane.b32.xlu1 %v1691_v7, %s1483_s22  ;;  %s1231_s22 = scalar_lea.sflag [#allocation5], %s298_s29 }
  0xcf   : > { %v801_v40 = vpop.permute.xlu1 %800  ;;  %v817_v41 = vpop.permute.xlu0 %816 }
  0xd0   : > { %v811_v42 = vmul.f32 %v806_v38, %v801_v40  ;;  %v812_v43 = vmul.f32 %v810_v39, %v801_v40  ;;  %v827_v48 = vmul.f32 %v822_v44, %v817_v41  ;;  %v828_v49 = vmul.f32 %v826_v45, %v817_v41  ;;  %v1313_v41 = vld [vmem:[%s2128_s1 + $0x2] ss:$8 sm:$0x3] }
  0xd2   : > { %v813_v46 = vadd.f32 %v811_v42, %v797_v36  ;;  %v814_v47 = vadd.f32 %v812_v43, %v798_v37  ;;  %1027 = vrot.lane.b32.xlu1 %v1689_v6, %s1484_s23  ;;  %v1311_v36 = vld [vmem:[%s2128_s1 + $0x1] ss:$8 sm:$0x3]  ;;  %v1315_v42 = vld [vmem:[%s2128_s1 + $0x3] ss:$8 sm:$0x3] }
  0xd3   : > { %v1757_v50 = vpop.permute.xlu1 %889  ;;  %v528_v39 = vrot.slane %v1311_v36, %v1653_v17  ;;  %v532_v40 = vrot.slane %v1311_v36, %v1655_v19 }
  0xd4   : > { %v829_v51 = vadd.f32 %v827_v48, %v813_v46  ;;  %v830_v52 = vadd.f32 %v828_v49, %v814_v47  ;;  %v1810_v48 = vld [vmem:[%s2128_s1 + $0x5] ss:$8 sm:$0x3]  ;;  %v1816_v49 = vld [vmem:[%s2128_s1 + $0x6] ss:$8 sm:$0x3] }
  0xd6   : > { %1029 = vrot.lane.b32.xlu1 %v1691_v7, %s1484_s23  ;;  %s1412_s23 = scalar_lea.vmem %s1246_s15, 128 }
  0xd7   : > { %p1413_p11 = scmp.ne.s32.totalorder %s1246_s15, %s1412_s23 }
  0xd8   : > { %v833_v55 = vpop.permute.xlu1 %832 }
  0xd9   : > { %v843_v57 = vmul.f32 %v838_v53, %v833_v55  ;;  %v844_v58 = vmul.f32 %v842_v54, %v833_v55  ;;  %v706_v53 = vrot.slane %v1315_v42, %v1653_v17  ;;  %p1414_p12 = pnand %p1413_p11, %p1576_p5 }
  0xda   : > { %1116 = vrot.lane.b32.xlu1 %v1689_v6, %s1485_s24 }
  0xdb   : > { %v1765_v59 = vadd.f32 %v843_v57, %v829_v51  ;;  %v1767_v60 = vadd.f32 %v844_v58, %v830_v52  ;;  %v617_v51 = vrot.slane %v1313_v41, %v1653_v17  ;;  %v621_v52 = vrot.slane %v1313_v41, %v1655_v19  ;;  %p1415_p13 = pneg %p1414_p12 }
  0xdc   : > { %v710_v57 = vrot.slane %v1315_v42, %v1655_v19 }
  0xdd   : > { %2145 = vst [vmem:[#allocation9_spill] sm:$0xff] %v1765_v59  ;;  %v1776_v62 = vpop.permute.xlu1 %978 }
  0xde   : > { %1118 = vrot.lane.b32.xlu1 %v1691_v7, %s1485_s24  ;;  %s1486_s24 = smov [#allocation4]  }
  0xdf   : > { %s1416_s6 = sshll.u32 %s1486_s24, 4  ;;  %s1417_s6 = int_to_ptr.vmem [resolvable:$false] %s1416_s6 }
  0xe0   : > { %s1418_s25 = scalar_lea.vmem %s1417_s6, 256  ;;  %p1419_p0 = scmp.lt.s32.totalorder %s1246_s15, %s1417_s6 }
  0xe1   : > { %p1420_p1 = scmp.lt.s32.totalorder %s1418_s25, %s1412_s23 }
  0xe2   : > { %1099 = vperm.xlu1 %1408, %v1624_v12   ;;  %v1778_v63 = vpop.permute.xlu1 %921 }
  0xe3   : > { %p1421_p2 = por %p1420_p1, %p1419_p0 }
  0xe5   : > { %p1422_p3 = pnand %p1421_p2, %p1415_p13 }
  0xe6   : > { %1188 = vperm.xlu1 %1408, %v1633_v14   ;;  %v1787_v14 = vand.u32 127, %v314_v15 }
  0xe7   : > { %v1780_v0 = vpop.permute.xlu1 %1067 }
  0xe8   : > { %vm434_vm2 = vcmp.lt.s32.totalorder %v1787_v14, 17  ;;  %vm519_vm3 = vcmp.lt.s32.totalorder %v1787_v14, 16  ;;  %vm608_vm4 = vcmp.lt.s32.totalorder %v1787_v14, 15  ;;  %vm697_vm5 = vcmp.lt.s32.totalorder %v1787_v14, 1 }
  0xe9   : > { %vm853_vm6 = vcmp.lt.s32.totalorder %v1787_v14, 127  ;;  %vm942_vm7 = vcmp.lt.s32.totalorder %v1787_v14, 113  ;;  %vm1031_vm8 = vcmp.lt.s32.totalorder %v1787_v14, 112  ;;  %vm1120_vm9 = vcmp.lt.s32.totalorder %v1787_v14, 111 }
  0xea   : > { %1409 = vset.pattern.permute.xlu1 %v1475_v2  ;;  %v437_v2 = vld [vmem:[%s2128_s1] ss:$8 sm:$0x3] }
  0xeb   : > { %1208 = vperm.xlu1 %1409, %v1205_v61   ;;  %v442_v33 = vrot.slane %v437_v2, %v1653_v17  ;;  %v446_v34 = vrot.slane %v437_v2, %v1655_v19  ;;  %v1832_v61 = vld [vmem:[%s2128_s1 + $0x7] ss:$8 sm:$0x3] }
  0xec   : > { %v1782_v4 = vpop.permute.xlu1 %1010 }
  0xed   : > { %2146 = vst [vmem:[#allocation10_spill] sm:$0xff] %v1782_v4 }
  0xf1   : > { %v1784_v5 = vpop.permute.xlu1 %1156 }
  0xf2   : > { %2147 = vst [vmem:[#allocation11_spill] sm:$0xff] %v1784_v5 }
 0x118   : > { %v431_v12 = vpop.permute.xlu1 %430  ;;  %v429_v32 = vpop.permute.xlu0 %428 }
 0x119   : > { %v435_v38 = vsel %vm434_vm2, %v429_v32, %v431_v12  ;;  %v436_v15 = vsel %vm434_vm2, %v431_v12, %v429_v32 }
 0x11a   : > { %v449_v43 = vmul.f32 %v442_v33, %v436_v15  ;;  %v450_v44 = vmul.f32 %v446_v34, %v435_v38 }
 0x11c   : > { %v516_v6 = vpop.permute.xlu1 %515  ;;  %v460_v12 = vrot.slane %v449_v43, %v1653_v17  ;;  %v474_v33 = vrot.slane %v449_v43, %v1655_v19  ;;  %v478_v34 = vrot.slane %v450_v44, %v1655_v19  ;;  %v490_v15 = vrot.slane %v449_v43, %v1657_v21 }
 0x11d   : > { %v510_v32 = vrot.slane %v450_v44, %v1661_v24 }
 0x11e   : > { %v465_v58 = vmul.f32 %v460_v12, %v1706_v18  ;;  %v479_v4 = vmul.f32 %v474_v33, %v1687_v3  ;;  %v480_v5 = vmul.f32 %v478_v34, %v1687_v3  ;;  %v495_v35 = vmul.f32 %v490_v15, %v1697_v9 }
 0x11f   : > { %v512_v34 = vmul.f32 %v510_v32, %v1683_v56 }
 0x120   : > { %v518_v7 = vpop.permute.xlu1 %517 }
 0x121   : > { %v520_v45 = vsel %vm519_vm3, %v516_v6, %v518_v7  ;;  %v521_v46 = vsel %vm519_vm3, %v518_v7, %v516_v6  ;;  %v464_v6 = vrot.slane %v450_v44, %v1653_v17 }
 0x122   : > { %v1822_v54 = vmul.f32 %v528_v39, %v521_v46  ;;  %v1824_v55 = vmul.f32 %v532_v40, %v520_v45  ;;  %v494_v39 = vrot.slane %v450_v44, %v1657_v21 }
 0x123   : > { %v466_v22 = vmul.f32 %v464_v6, %v1706_v18 }
 0x124   : > { %v605_v37 = vpop.permute.xlu1 %604  ;;  %v547_v42 = vrot.slane %v1822_v54, %v1653_v17  ;;  %v551_v45 = vrot.slane %v1824_v55, %v1653_v17  ;;  %v561_v46 = vrot.slane %v1822_v54, %v1655_v19  ;;  %v496_v59 = vmul.f32 %v494_v39, %v1697_v9 }
 0x125   : > { %v482_v15 = vadd.f32 %v480_v5, %v466_v22  ;;  %v577_v39 = vrot.slane %v1822_v54, %v1657_v21 }
 0x126   : > { %v566_v18 = vmul.f32 %v561_v46, %v1703_v16  ;;  %v593_v46 = vrot.slane %v1822_v54, %v1661_v24 }
 0x128   : > { %v607_v47 = vpop.permute.xlu1 %606 }
 0x129   : > { %v609_v36 = vsel %vm608_vm4, %v605_v37, %v607_v47  ;;  %v610_v38 = vsel %vm608_vm4, %v607_v47, %v605_v37  ;;  %v565_v37 = vrot.slane %v1824_v55, %v1655_v19  ;;  %v506_v47 = vrot.slane %v449_v43, %v1661_v24 }
 0x12a   : > { %v1862_v40 = vmul.f32 %v617_v51, %v610_v38  ;;  %v1864_v2 = vmul.f32 %v621_v52, %v609_v36  ;;  %v552_v51 = vmul.f32 %v547_v42, %v1712_v23  ;;  %v553_v52 = vmul.f32 %v551_v45, %v1712_v23 }
 0x12b   : > { %v567_v12 = vmul.f32 %v565_v37, %v1703_v16  ;;  %v511_v23 = vmul.f32 %v506_v47, %v1683_v56  ;;  %v481_v38 = vadd.f32 %v479_v4, %v465_v58  ;;  %v597_v56 = vrot.slane %v1824_v55, %v1661_v24 }
 0x12c   : > { %v694_v7 = vpop.permute.xlu1 %693  ;;  %v636_v3 = vrot.slane %v1862_v40, %v1653_v17  ;;  %v640_v9 = vrot.slane %v1864_v2, %v1653_v17  ;;  %v650_v6 = vrot.slane %v1862_v40, %v1655_v19  ;;  %v568_v42 = vadd.f32 %v566_v18, %v552_v51 }
 0x12d   : > { %v569_v45 = vadd.f32 %v567_v12, %v553_v52  ;;  %v670_v47 = vrot.slane %v1864_v2, %v1657_v21  ;;  %v598_v51 = vmul.f32 %v593_v46, %v1685_v1  ;;  %v599_v52 = vmul.f32 %v597_v56, %v1685_v1 }
 0x12e   : > { %v655_v22 = vmul.f32 %v650_v6, %v1718_v25  ;;  %v682_v1 = vrot.slane %v1862_v40, %v1661_v24 }
 0x130   : > { %v696_v41 = vpop.permute.xlu1 %695 }
 0x131   : > { %v698_v43 = vsel %vm697_vm5, %v694_v7, %v696_v41  ;;  %v699_v44 = vsel %vm697_vm5, %v696_v41, %v694_v7  ;;  %v654_v7 = vrot.slane %v1864_v2, %v1655_v19  ;;  %v581_v41 = vrot.slane %v1824_v55, %v1657_v21 }
 0x132   : > { %v1891_v16 = vmul.f32 %v706_v53, %v699_v44  ;;  %v1893_v36 = vmul.f32 %v710_v57, %v698_v43  ;;  %v641_v53 = vmul.f32 %v636_v3, %v1716_v10  ;;  %v642_v57 = vmul.f32 %v640_v9, %v1716_v10 }
 0x133   : > { %v656_v4 = vmul.f32 %v654_v7, %v1718_v25  ;;  %v582_v10 = vmul.f32 %v577_v39, %v1709_v20  ;;  %v583_v37 = vmul.f32 %v581_v41, %v1709_v20  ;;  %v666_v25 = vrot.slane %v1862_v40, %v1657_v21 }
 0x134   : > { %v850_v33 = vpop.permute.xlu1 %849  ;;  %v725_v58 = vrot.slane %v1891_v16, %v1653_v17  ;;  %v729_v32 = vrot.slane %v1893_v36, %v1653_v17  ;;  %v739_v54 = vrot.slane %v1891_v16, %v1655_v19  ;;  %v743_v55 = vrot.slane %v1893_v36, %v1655_v19 }
 0x135   : > { %v497_v43 = vadd.f32 %v495_v35, %v481_v38  ;;  %v498_v44 = vadd.f32 %v496_v59, %v482_v15  ;;  %v584_v18 = vadd.f32 %v582_v10, %v568_v42  ;;  %v585_v12 = vadd.f32 %v583_v37, %v569_v45 }
 0x136   : > { %v657_v3 = vadd.f32 %v655_v22, %v641_v53  ;;  %v658_v9 = vadd.f32 %v656_v4, %v642_v57  ;;  %v730_v7 = vmul.f32 %v725_v58, %v1722_v11  ;;  %v731_v20 = vmul.f32 %v729_v32, %v1722_v11 }
 0x137   : > { %v744_v39 = vmul.f32 %v739_v54, %v1730_v28  ;;  %v745_v41 = vmul.f32 %v743_v55, %v1730_v28  ;;  %v671_v35 = vmul.f32 %v666_v25, %v1725_v26  ;;  %v672_v59 = vmul.f32 %v670_v47, %v1725_v26 }
 0x138   : > { %v852_v5 = vpop.permute.xlu1 %851  ;;  %v686_v38 = vrot.slane %v1864_v2, %v1661_v24  ;;  %v755_v15 = vrot.slane %v1891_v16, %v1657_v21  ;;  %v759_v11 = vrot.slane %v1893_v36, %v1657_v21  ;;  %v513_v42 = vadd.f32 %v511_v23, %v497_v43 }
 0x139   : > { %v854_v28 = vsel %vm853_vm6, %v850_v33, %v852_v5  ;;  %v855_v26 = vsel %vm853_vm6, %v852_v5, %v850_v33  ;;  %v514_v45 = vadd.f32 %v512_v34, %v498_v44  ;;  %v673_v40 = vadd.f32 %v671_v35, %v657_v3 }
 0x13a   : > { %v674_v46 = vadd.f32 %v672_v59, %v658_v9  ;;  %v600_v2 = vadd.f32 %v598_v51, %v584_v18  ;;  %v601_v53 = vadd.f32 %v599_v52, %v585_v12  ;;  %v746_v57 = vadd.f32 %v744_v39, %v730_v7 }
 0x13b   : > { %v747_v22 = vadd.f32 %v745_v41, %v731_v20  ;;  %v687_v4 = vmul.f32 %v682_v1, %v1693_v8  ;;  %v688_v58 = vmul.f32 %v686_v38, %v1693_v8  ;;  %v2148_v32 = vrot.slane %v1810_v48, %v1653_v17 }
 0x13c   : > { %v939_v6 = vpop.permute.xlu1 %938  ;;  %v2149_v33 = vrot.slane %v1810_v48, %v1655_v19  ;;  %v760_v34 = vmul.f32 %v755_v15, %v1735_v30  ;;  %v761_v5 = vmul.f32 %v759_v11, %v1735_v30  ;;  %v771_v55 = vrot.slane %v1891_v16, %v1661_v24 }
 0x13d   : > { %v1948_v54 = vmul.f32 %v2148_v32, %v854_v28  ;;  %v775_v8 = vrot.slane %v1893_v36, %v1661_v24  ;;  %v689_v10 = vadd.f32 %v687_v4, %v673_v40  ;;  %v690_v37 = vadd.f32 %v688_v58, %v674_v46  ;;  %v906_v32 = vpop.permute.xlu0 %905 }
 0x13e   : > { %v1953_v23 = vmul.f32 %v2149_v33, %v855_v26  ;;  %v762_v43 = vadd.f32 %v760_v34, %v746_v57  ;;  %v763_v44 = vadd.f32 %v761_v5, %v747_v22  ;;  %v602_v51 = vadd.f32 %v600_v2, %v513_v42  ;;  %v1324_v42 = vld [vmem:[%s2128_s1 + $0x10] ss:$8 sm:$0x3] }
 0x13f   : > { %v603_v52 = vadd.f32 %v601_v53, %v514_v45  ;;  %v881_v30 = vrot.slane %v1948_v54, %v1653_v17  ;;  %v895_v36 = vrot.slane %v1948_v54, %v1655_v19  ;;  %v776_v12 = vmul.f32 %v771_v55, %v1699_v13 }
 0x140   : > { %v941_v56 = vpop.permute.xlu1 %940  ;;  %v885_v16 = vrot.slane %v1953_v23, %v1653_v17  ;;  %v899_v18 = vrot.slane %v1953_v23, %v1655_v19  ;;  %v777_v3 = vmul.f32 %v775_v8, %v1699_v13  ;;  %v2150_v9 = vrot.slane %v1816_v49, %v1653_v17 }
 0x141   : > { %v943_v25 = vsel %vm942_vm7, %v939_v6, %v941_v56  ;;  %v944_v48 = vsel %vm942_vm7, %v941_v56, %v939_v6  ;;  %v2151_v7 = vrot.slane %v1816_v49, %v1655_v19  ;;  %v691_v39 = vadd.f32 %v689_v10, %v602_v51 }
 0x142   : > { %v1978_v6 = vmul.f32 %v2150_v9, %v943_v25  ;;  %v692_v41 = vadd.f32 %v690_v37, %v603_v52  ;;  %v1044_v35 = vrot.slane %v1832_v61, %v1655_v19  ;;  %v778_v1 = vadd.f32 %v776_v12, %v762_v43  ;;  %v995_v9 = vpop.permute.xlu0 %994 }
 0x143   : > { %v1983_v20 = vmul.f32 %v2151_v7, %v944_v48  ;;  %v779_v13 = vadd.f32 %v777_v3, %v763_v44  ;;  %v886_v49 = vmul.f32 %v881_v30, %v1728_v27  ;;  %v887_v11 = vmul.f32 %v885_v16, %v1728_v27 }
 0x144   : > { %v1028_v47 = vpop.permute.xlu1 %1027  ;;  %v900_v28 = vmul.f32 %v895_v36, %v1757_v50  ;;  %v901_v26 = vmul.f32 %v899_v18, %v1757_v50  ;;  %v911_v45 = vrot.slane %v1948_v54, %v1657_v21  ;;  %v915_v40 = vrot.slane %v1953_v23, %v1657_v21 }
 0x145   : > { %v970_v46 = vrot.slane %v1978_v6, %v1653_v17  ;;  %v974_v27 = vrot.slane %v1983_v20, %v1653_v17  ;;  %v984_v56 = vrot.slane %v1978_v6, %v1655_v19  ;;  %v988_v50 = vrot.slane %v1983_v20, %v1655_v19 }
 0x146   : > { %v2152_v2 = vrot.slane %v1832_v61, %v1653_v17  ;;  %v780_v4 = vadd.f32 %v778_v1, %v691_v39  ;;  %v781_v58 = vadd.f32 %v779_v13, %v692_v41  ;;  %v1129_v33 = vrot.slane %v1324_v42, %v1653_v17 }
 0x147   : > { %v1133_v34 = vrot.slane %v1324_v42, %v1655_v19  ;;  %v902_v5 = vadd.f32 %v900_v28, %v886_v49  ;;  %v903_v55 = vadd.f32 %v901_v26, %v887_v11  ;;  %v927_v8 = vrot.slane %v1948_v54, %v1661_v24  ;;  %v2153_v42 = vld [vmem:[#allocation9_spill] sm:$0xff] }
 0x148   : > { %v1030_v59 = vpop.permute.xlu1 %1029  ;;  %v931_v61 = vrot.slane %v1953_v23, %v1661_v24  ;;  %v916_v10 = vmul.f32 %v911_v45, %v906_v32  ;;  %v917_v37 = vmul.f32 %v915_v40, %v906_v32  ;;  %v975_v25 = vmul.f32 %v970_v46, %v1733_v29  ;;  %v1084_v46 = vpop.permute.xlu0 %1083 }
 0x149   : > { %v1032_v38 = vsel %vm1031_vm8, %v1028_v47, %v1030_v59  ;;  %v1033_v15 = vsel %vm1031_vm8, %v1030_v59, %v1028_v47  ;;  %v976_v48 = vmul.f32 %v974_v27, %v1733_v29  ;;  %v989_v47 = vmul.f32 %v984_v56, %v1776_v62 }
 0x14a   : > { %v2014_v53 = vmul.f32 %v2152_v2, %v1032_v38  ;;  %v2016_v57 = vmul.f32 %v1044_v35, %v1033_v15  ;;  %v990_v43 = vmul.f32 %v988_v50, %v1776_v62  ;;  %v932_v62 = vmul.f32 %v927_v8, %v1778_v63 }
 0x14b   : > { %v933_v16 = vmul.f32 %v931_v61, %v1778_v63  ;;  %v918_v12 = vadd.f32 %v916_v10, %v902_v5  ;;  %v919_v3 = vadd.f32 %v917_v37, %v903_v55  ;;  %v1000_v7 = vrot.slane %v1978_v6, %v1657_v21 }
 0x14c   : > { %v1117_v22 = vpop.permute.xlu1 %1116  ;;  %v1059_v44 = vrot.slane %v2014_v53, %v1653_v17  ;;  %v1063_v51 = vrot.slane %v2016_v57, %v1653_v17  ;;  %v1073_v23 = vrot.slane %v2014_v53, %v1655_v19  ;;  %v1077_v52 = vrot.slane %v2016_v57, %v1655_v19 }
 0x14d   : > { %v1004_v39 = vrot.slane %v1983_v20, %v1657_v21  ;;  %v1016_v14 = vrot.slane %v1978_v6, %v1661_v24  ;;  %v1020_v41 = vrot.slane %v1983_v20, %v1661_v24  ;;  %v991_v63 = vadd.f32 %v989_v47, %v975_v25 }
 0x14e   : > { %v992_v35 = vadd.f32 %v990_v43, %v976_v48  ;;  %v1064_v59 = vmul.f32 %v1059_v44, %v1738_v31  ;;  %v1065_v1 = vmul.f32 %v1063_v51, %v1738_v31  ;;  %v1078_v13 = vmul.f32 %v1073_v23, %v1780_v0 }
 0x14f   : > { %v1079_v38 = vmul.f32 %v1077_v52, %v1780_v0  ;;  %v1089_v11 = vrot.slane %v2014_v53, %v1657_v21  ;;  %v1093_v31 = vrot.slane %v2016_v57, %v1657_v21  ;;  %v1005_v28 = vmul.f32 %v1000_v7, %v995_v9 }
 0x150   : > { %v1119_v54 = vpop.permute.xlu1 %1118  ;;  %v1006_v0 = vmul.f32 %v1004_v39, %v995_v9  ;;  %v848_v26 = vadd.f32 %v1767_v60, %v781_v58  ;;  %v847_v45 = vadd.f32 %v2153_v42, %v780_v4  ;;  %v934_v40 = vadd.f32 %v932_v62, %v918_v12  ;;  %v2156_v60 = vld [vmem:[#allocation10_spill] sm:$0xff]  ;;  %v1173_v62 = vpop.permute.xlu0 %1172 }
 0x151   : > { %v1121_v29 = vsel %vm1120_vm9, %v1117_v22, %v1119_v54  ;;  %v1122_v30 = vsel %vm1120_vm9, %v1119_v54, %v1117_v22  ;;  %v1080_v27 = vadd.f32 %v1078_v13, %v1064_v59  ;;  %v1081_v56 = vadd.f32 %v1079_v38, %v1065_v1 }
 0x152   : > { %v2042_v36 = vmul.f32 %v1129_v33, %v1121_v29  ;;  %v2044_v18 = vmul.f32 %v1133_v34, %v1122_v30  ;;  %v1007_v50 = vadd.f32 %v1005_v28, %v991_v63  ;;  %v1008_v2 = vadd.f32 %v1006_v0, %v992_v35  ;;  %v2155_v33 = vld [vmem:[#allocation11_spill] sm:$0xff] }
 0x153   : > { %v1094_v55 = vmul.f32 %v1089_v11, %v1084_v46  ;;  %v1095_v8 = vmul.f32 %v1093_v31, %v1084_v46  ;;  %v1021_v58 = vmul.f32 %v1016_v14, %v2156_v60  ;;  %v1022_v4 = vmul.f32 %v1020_v41, %v2156_v60  ;;  %v2157_v11 = vld [vmem:[#allocation7_spill] sm:$0xff] }
 0x154   : > { %v1148_v15 = vrot.slane %v2042_v36, %v1653_v17  ;;  %v1152_v49 = vrot.slane %v2044_v18, %v1653_v17  ;;  %v1162_v6 = vrot.slane %v2042_v36, %v1655_v19  ;;  %v1166_v20 = vrot.slane %v2044_v18, %v1655_v19  ;;  %v2154_v19 = vld [vmem:[#allocation8_spill] sm:$0xff] }
 0x155   : > { %v935_v17 = vadd.f32 %v933_v16, %v919_v3  ;;  %v1105_v61 = vrot.slane %v2014_v53, %v1661_v24  ;;  %v1109_v10 = vrot.slane %v2016_v57, %v1661_v24  ;;  %v1178_v37 = vrot.slane %v2042_v36, %v1657_v21 }
 0x156   : > { %v1153_v22 = vmul.f32 %v1148_v15, %v2154_v19  ;;  %v1154_v32 = vmul.f32 %v1152_v49, %v2154_v19  ;;  %v1167_v34 = vmul.f32 %v1162_v6, %v2155_v33  ;;  %v1168_v5 = vmul.f32 %v1166_v20, %v2155_v33 }
 0x157   : > { %v1182_v25 = vrot.slane %v2044_v18, %v1657_v21  ;;  %v1096_v47 = vadd.f32 %v1094_v55, %v1080_v27  ;;  %v1097_v43 = vadd.f32 %v1095_v8, %v1081_v56  ;;  %v1023_v44 = vadd.f32 %v1021_v58, %v1007_v50 }
 0x158   : > { %v1024_v51 = vadd.f32 %v1022_v4, %v1008_v2  ;;  %v1169_v52 = vadd.f32 %v1167_v34, %v1153_v22  ;;  %v1170_v29 = vadd.f32 %v1168_v5, %v1154_v32  ;;  %v936_v30 = vadd.f32 %v934_v40, %v847_v45 }
 0x159   : > { %v937_v53 = vadd.f32 %v935_v17, %v848_v26  ;;  %v1194_v57 = vrot.slane %v2042_v36, %v1661_v24  ;;  %v1198_v16 = vrot.slane %v2044_v18, %v1661_v24  ;;  %v1183_v3 = vmul.f32 %v1178_v37, %v1173_v62 }
 0x15a   : > { %v1184_v9 = vmul.f32 %v1182_v25, %v1173_v62  ;;  %v1025_v39 = vadd.f32 %v1023_v44, %v936_v30  ;;  %v1216_v49 = vstv %s1213_s28  ;;  %v1221_v31 = vcombine.high %v2157_v11, %v2157_v11 }
 0x15b   : > { %v1026_v14 = vadd.f32 %v1024_v51, %v937_v53  ;;  %v1185_v41 = vadd.f32 %v1183_v3, %v1169_v52 }
 0x15c   : > { %v1186_v63 = vadd.f32 %v1184_v9, %v1170_v29 }
 0x15d   : > { %v1100_v48 = vpop.permute.xlu1 %1099 }
 0x15e   : > { %v1110_v54 = vmul.f32 %v1105_v61, %v1100_v48  ;;  %v1111_v23 = vmul.f32 %v1109_v10, %v1100_v48 }
 0x160   : > { %v1112_v21 = vadd.f32 %v1110_v54, %v1096_v47  ;;  %v1113_v12 = vadd.f32 %v1111_v23, %v1097_v43 }
 0x161   : > { %v1189_v7 = vpop.permute.xlu1 %1188 }
 0x162   : > { %v1199_v35 = vmul.f32 %v1194_v57, %v1189_v7  ;;  %v1200_v59 = vmul.f32 %v1198_v16, %v1189_v7  ;;  %v1114_v38 = vadd.f32 %v1112_v21, %v1025_v39  ;;  %v1115_v36 = vadd.f32 %v1113_v12, %v1026_v14 }
 0x164   : > { %v1201_v1 = vadd.f32 %v1199_v35, %v1185_v41  ;;  %v1202_v13 = vadd.f32 %v1200_v59, %v1186_v63 }
 0x166   : > { %v1209_v15 = vpop.permute.xlu1 %1208  ;;  %v1203_v24 = vadd.f32 %v1201_v1, %v1114_v38  ;;  %v1204_v18 = vadd.f32 %v1202_v13, %v1115_v36 }
 0x168   : > { %v1211_v6 = vadd.f32 %v1209_v15, %v1203_v24  ;;  %v1212_v20 = vadd.f32 %v1209_v15, %v1204_v18 }
 0x16a   : > { %vm1214_vm10 = vcmp.gt.f32.partialorder %v1211_v6, 0.0  ;;  %vm1215_vm11 = vcmp.gt.f32.partialorder %v1212_v20, 0.0  ;;  %v1217_v28 = vmul.f32 %v1216_v49, %v1211_v6  ;;  %v1218_v0 = vmul.f32 %v1216_v49, %v1212_v20 }
 0x16c   : > { %v1219_v26 = vsel %vm1214_vm10, %v1211_v6, %v1217_v28  ;;  %v1220_v42 = vsel %vm1215_vm11, %v1212_v20, %v1218_v0 }
 0x16d   : > { %v1223_v45 = vadd.f32 %v1219_v26, %v2157_v11  ;;  %v1224_v40 = vadd.f32 %v1221_v31, %v1220_v42 }
 0x16f   : > { %v1227_v17 = vcombine.low %v1223_v45, %v1224_v40 }
 0x171   : > { %1229 = vst [vmem:[%s300_s14] sm:$0xff] %v1227_v17 }
 0x172   : > { %1425 = shalt.err (!%p1422_p3)
}
 0x173   : > { %s1426_s26 = scalar_lea.hbm %s1243_s21, 128  ;;  %s1430_s29 = scalar_lea.hbm %s2135_s8, 256 }
 0x174   : > { %p1427_p4 = scmp.ne.s32.totalorder %s1243_s21, %s1426_s26  ;;  %p1431_p9 = scmp.lt.s32.totalorder %s1243_s21, %s2135_s8 }
 0x175   : > { %p1432_p10 = scmp.lt.s32.totalorder %s1430_s29, %s1426_s26 }
 0x176   : > { %p1428_p7 = pnand %p1427_p4, %p1576_p5 }
 0x177   : > { %p1433_p11 = por %p1432_p10, %p1431_p9 }
 0x178   : > { %p1429_p8 = pneg %p1428_p7 }
 0x17a   : > { %p1434_p12 = pnand %p1433_p11, %p1429_p8 }
 0x17c   : > { %1437 = shalt.err (!%p1434_p12)
}
 0x17d   : > { %1333 = dma.vmem_to_hbm [thread:$0]  (%p1576_p5), %s1246_s15, 128, %s1243_s21, %s1231_s22  }
 0x17e PF: > { %p1339_p13 = scmp.ge.s32.totalorder %s1472_s12, 2  ;;  %s1257_s14 = sand.u32 1, %s1460_s9  }
 0x17f   : > { %s1258_s19 = scalar_lea.sflag [#allocation5], %s1257_s14 }
 0x180   : > { %p1336_p0 = pnand %p1339_p13, %p1580_p6 }
 0x182   : > { %p1337_p1 = pneg %p1336_p0 }
 0x184   : > { %1455 = dma.done.wait (%p1337_p1), %s1258_s19, 128  }
 0x185   : > { %1457 = vsyncadd (%p1337_p1), %s1258_s19, 4294967168  ;;  %p20_p2 = scmp.ge.s32.totalorder %s1563_s13, 4   ;;  %s2158_s9 = smov %s1464_s10 }
 0x186   : > { %s2159_s10 = smov %s1468_s11  ;;  %s2160_s11 = smov %s1574_s16 }
 0x187   : > { %s2161_s12 = smov %s1563_s13  ;;  %22 = sbr.rel (!%p20_p2) target bundleno = 6 (0x6), region = 102 }
 0x18c   :  { %1263 = vsyncpa [#allocation5], 1 }
 0x18d   :  { %1265 = vsyncpa [#allocation5 + $0x1], 1 }

</bundles_post_ra>
